<compile_context>
chip_gen: v7x
topology: tpu7x:2x2x1
jax: 0.10.0
libtpu: 0.0.40
codegen_flags: <defaults>
</compile_context>

<pallas_src>
import functools

import jax
import jax.numpy as jnp
from jax.experimental import pallas as pl
from jax.experimental.pallas import tpu as pltpu


def _round_up(x, m):
    return ((x + m - 1) // m) * m


# --------------------------------------------------------------------------- #
# Kernel
# --------------------------------------------------------------------------- #
def _critic_kernel(x_ref, w1_ref, w2_ref, w3_ref, wq_ref, b_ref, q_ref,
                   *, fc1, fc2, fc3):
    """One batch tile.  x_ref is (S+A, TB) feature-major (batch on lanes)."""
    cdt = w1_ref.dtype                                   # bf16 (default) or f32

    # packed biases: [b1; b2; b3; bq] as a (fc1+fc2+fc3+1, 1) column buffer
    b1 = b_ref[0:fc1, :]
    b2 = b_ref[fc1:fc1 + fc2, :]
    b3 = b_ref[fc1 + fc2:fc1 + fc2 + fc3, :]
    bq = b_ref[fc1 + fc2 + fc3:fc1 + fc2 + fc3 + 1, :]   # (1, 1)

    # fc1: (fc1, S+A) @ (S+A, TB) -> (fc1, TB), f32 accumulation on the MXU.
    # (action/max_action scaling is pre-folded into the action columns of W1.)
    h = jnp.dot(w1_ref[...], x_ref[...].astype(cdt),
                preferred_element_type=jnp.float32)
    h = jnp.maximum(h + b1, 0.0)
    # fc2
    h = jnp.dot(w2_ref[...], h.astype(cdt), preferred_element_type=jnp.float32)
    h = jnp.maximum(h + b2, 0.0)
    # fc3
    h = jnp.dot(w3_ref[...], h.astype(cdt), preferred_element_type=jnp.float32)
    h = jnp.maximum(h + b3, 0.0)
    # q head: (1, fc3) @ (fc3, TB) -> (1, TB); lane-dense output store.
    q_ref[...] = (jnp.dot(wq_ref[...], h.astype(cdt),
                          preferred_element_type=jnp.float32) + bq)


# --------------------------------------------------------------------------- #
# Parameter prep (done once, outside the per-step call)
# --------------------------------------------------------------------------- #
def prepare_params(params, *, state_dims, max_action=1.0,
                   weight_dtype=jnp.bfloat16):
    """params in PyTorch nn.Linear layout: w (out, in), b (out,).

    Folds `action / max_action` into the action columns of W1 (works for a
    scalar or a per-action-dim max_action), casts weights to `weight_dtype`
    (bf16 by default; f32 reproduces exact PyTorch numerics) and packs all
    biases into one (fc1+fc2+fc3+1, 1) float32 buffer.
    """
    w1, b1, w2, b2, w3, b3, wq, bq = params
    inv = jnp.asarray(1.0, jnp.float32) / jnp.asarray(max_action, jnp.float32)
    w1 = jnp.concatenate([w1[:, :state_dims], w1[:, state_dims:] * inv], axis=1)
    b_all = jnp.concatenate(
        [b1.reshape(-1), b2.reshape(-1), b3.reshape(-1), bq.reshape(-1)]
    ).astype(jnp.float32).reshape(-1, 1)
    cast = lambda w: w.astype(weight_dtype)
    return (cast(w1), cast(w2), cast(w3), cast(wq.reshape(1, -1)), b_all)


# --------------------------------------------------------------------------- #
# Forward wrapper
# --------------------------------------------------------------------------- #
def critic_forward(state, action, kparams, *, batch_tile=None):
    """Pallas forward pass.  state: [B,S] f32, action: [B,A] f32 -> q: [B,1] f32.

    batch_tile (if given) must be a multiple of 128 (lane width).
    """
    w1, w2, w3, wq, b_all = kparams
    B, S = state.shape
    A = action.shape[1]
    K = S + A
    fc1, fc2, fc3 = int(w1.shape[0]), int(w2.shape[0]), int(w3.shape[0])
    assert int(w1.shape[1]) == K, "W1 in-features must equal state_dims+n_actions"

    # feature-major input: batch on the lane dim (concat done once here).
    x = jnp.concatenate([state, action], axis=1).astype(jnp.float32).T  # (K, B)

    TB = batch_tile if batch_tile is not None else min(512, _round_up(B, 128))
    B_pad = _round_up(B, TB)
    if B_pad != B:
        x = jnp.pad(x, ((0, 0), (0, B_pad - B)))
    grid = (B_pad // TB,)

    kernel = functools.partial(_critic_kernel, fc1=fc1, fc2=fc2, fc3=fc3)
    resident = lambda shape: pl.BlockSpec(shape, lambda i: (0, 0))  # stays in VMEM

    flops = 2 * B_pad * (K * fc1 + fc1 * fc2 + fc2 * fc3 + fc3)
    bytes_accessed = int(
        x.size * 4 + B_pad * 4
        + sum(int(a.size) * a.dtype.itemsize for a in (w1, w2, w3, wq, b_all)))

    out = pl.pallas_call(
        kernel,
        out_shape=jax.ShapeDtypeStruct((1, B_pad), jnp.float32),
        grid=grid,
        in_specs=[
            pl.BlockSpec((K, TB), lambda i: (0, i)),   # activation tile (pipelined)
            resident((fc1, K)),                        # W1  (VMEM-resident)
            resident((fc2, fc1)),                      # W2
            resident((fc3, fc2)),                      # W3
            resident((1, fc3)),                        # Wq row
            resident((fc1 + fc2 + fc3 + 1, 1)),        # packed biases + bq
        ],
        out_specs=pl.BlockSpec((1, TB), lambda i: (0, i)),   # lane-dense q row
        compiler_params=pltpu.CompilerParams(
            dimension_semantics=("parallel",)),        # split tiles across v7x TCs
        cost_estimate=pl.CostEstimate(
            flops=flops, transcendentals=0, bytes_accessed=bytes_accessed),
    )(x, w1, w2, w3, wq, b_all)

    return out[0, :B].reshape(B, 1)


# --------------------------------------------------------------------------- #
# References & synthetic params
# --------------------------------------------------------------------------- #
def init_params(key, state_dims, n_actions, fc1=256, fc2=256, fc3=256):
    """Deterministic synthetic parameters in PyTorch nn.Linear layout."""
    ks = jax.random.split(key, 8)

    def lin(kw, kb, fan_in, fan_out):
        bound = 1.0 / (fan_in ** 0.5)
        w = jax.random.uniform(kw, (fan_out, fan_in), jnp.float32, -bound, bound)
        b = jax.random.uniform(kb, (fan_out,), jnp.float32, -bound, bound)
        return w, b

    w1, b1 = lin(ks[0], ks[1], state_dims + n_actions, fc1)
    w2, b2 = lin(ks[2], ks[3], fc1, fc2)
    w3, b3 = lin(ks[4], ks[5], fc2, fc3)
    wq, bq = lin(ks[6], ks[7], fc3, 1)
    return (w1, b1, w2, b2, w3, b3, wq, bq)


def critic_reference_f32(state, action, params, *, max_action=1.0):
    """Pure-f32 reference with exactly the PyTorch forward semantics."""
    w1, b1, w2, b2, w3, b3, wq, bq = params
    hp = jax.lax.Precision.HIGHEST
    x = jnp.concatenate([state, action / max_action], axis=1)
    h = jax.nn.relu(jnp.dot(x, w1.T, precision=hp) + b1)
    h = jax.nn.relu(jnp.dot(h, w2.T, precision=hp) + b2)
    h = jax.nn.relu(jnp.dot(h, w3.T, precision=hp) + b3)
    return jnp.dot(h, wq.T, precision=hp) + bq


def critic_reference_matched(state, action, kparams):
    """Reference that matches the kernel's precision (bf16 inputs, f32 acc)."""
    w1, w2, w3, wq, b_all = kparams
    fc1, fc2, fc3 = int(w1.shape[0]), int(w2.shape[0]), int(w3.shape[0])
    b1 = b_all[:fc1, 0]
    b2 = b_all[fc1:fc1 + fc2, 0]
    b3 = b_all[fc1 + fc2:fc1 + fc2 + fc3, 0]
    bq = b_all[fc1 + fc2 + fc3, 0]
    cdt = w1.dtype
    x = jnp.concatenate([state, action], axis=1).astype(cdt)
    h = jax.nn.relu(jnp.dot(x, w1.T, preferred_element_type=jnp.float32) + b1)
    h = jax.nn.relu(jnp.dot(h.astype(cdt), w2.T,
                            preferred_element_type=jnp.float32) + b2)
    h = jax.nn.relu(jnp.dot(h.astype(cdt), w3.T,
                            preferred_element_type=jnp.float32) + b3)
    return jnp.dot(h.astype(cdt), wq.T, preferred_element_type=jnp.float32) + bq


# --------------------------------------------------------------------------- #
# Self-test
# --------------------------------------------------------------------------- #
if __name__ == "__main__":
    S, A = 12, 4                 # state_dims, n_actions
    MAX_ACTION = 2.0

    key = jax.random.PRNGKey(0)
    k_state, k_action, k_params, k_big = jax.random.split(key, 4)

    params = init_params(k_params, S, A)          # fc1=fc2=fc3=256 (module defaults)

    # ---- small batch -------------------------------------------------------
    B = 8
    state = jax.random.normal(k_state, (B, S), jnp.float32)
    action = jax.random.normal(k_action, (B, A), jnp.float32)

    kp_bf16 = prepare_params(params, state_dims=S, max_action=MAX_ACTION)
    kp_f32 = prepare_params(params, state_dims=S, max_action=MAX_ACTION,
                            weight_dtype=jnp.float32)

    q_bf16 = jax.block_until_ready(critic_forward(state, action, kp_bf16))
    q_f32 = jax.block_until_ready(critic_forward(state, action, kp_f32))

    q_ref32 = critic_reference_f32(state, action, params, max_action=MAX_ACTION)
    q_refbf = critic_reference_matched(state, action, kp_bf16)

    assert q_bf16.shape == (B, 1) and q_f32.shape == (B, 1)
    assert jnp.allclose(q_f32, q_ref32, atol=5e-3, rtol=5e-3), "f32 kernel mismatch"
    assert jnp.allclose(q_bf16, q_refbf, atol=1e-3, rtol=1e-3), "bf16 kernel mismatch"
    assert jnp.allclose(q_bf16, q_ref32, atol=5e-2, rtol=5e-2), "bf16 vs f32 reference drift"

    # ---- larger batch: exercises the batch grid (TB=512, 2 tiles) + padding --
    Bl = 1000
    ks, ka = jax.random.split(k_big)
    state_l = jax.random.normal(ks, (Bl, S), jnp.float32)
    action_l = jax.random.normal(ka, (Bl, A), jnp.float32)
    q_l = jax.block_until_ready(critic_forward(state_l, action_l, kp_bf16))
    q_l_ref = critic_reference_matched(state_l, action_l, kp_bf16)
    assert q_l.shape == (Bl, 1)
    assert jnp.allclose(q_l, q_l_ref, atol=1e-3, rtol=1e-3), "large-batch mismatch"

    print("KERNEL_OK")
</pallas_src>

<mosaic_0001>
module attributes {stable_mosaic.version = 11 : i64} {
  func.func @_critic_kernel(%arg0: i32, %arg1: memref<16x128xf32, #tpu.memory_space<vmem>>, %arg2: memref<256x16xbf16, #tpu.memory_space<vmem>>, %arg3: memref<256x256xbf16, #tpu.memory_space<vmem>>, %arg4: memref<256x256xbf16, #tpu.memory_space<vmem>>, %arg5: memref<1x256xbf16, #tpu.memory_space<vmem>>, %arg6: memref<769x1xf32, #tpu.memory_space<vmem>>, %arg7: memref<1x128xf32, #tpu.memory_space<vmem>>) attributes {dimension_semantics = [#tpu.dimension_semantics<parallel>], iteration_bounds = array<i64: 1>, scalar_prefetch = 0 : i64, scratch_operands = 0 : i64, tpu.core_type = #tpu.core_type<tc>, window_params = [{transform_indices = @transform_0, window_bounds = array<i64: 16, 128>}, {pipeline_mode = #tpu.pipeline_mode<synchronous>, transform_indices = @transform_1, window_bounds = array<i64: 256, 16>}, {pipeline_mode = #tpu.pipeline_mode<synchronous>, transform_indices = @transform_2, window_bounds = array<i64: 256, 256>}, {pipeline_mode = #tpu.pipeline_mode<synchronous>, transform_indices = @transform_3, window_bounds = array<i64: 256, 256>}, {pipeline_mode = #tpu.pipeline_mode<synchronous>, transform_indices = @transform_4, window_bounds = array<i64: 1, 256>}, {pipeline_mode = #tpu.pipeline_mode<synchronous>, transform_indices = @transform_5, window_bounds = array<i64: 769, 1>}, {transform_indices = @transform_6, window_bounds = array<i64: 1, 128>}]} {
    %c0 = arith.constant 0 : index
    %c0_0 = arith.constant 0 : index
    %0 = vector.load %arg6[%c0, %c0_0] : memref<769x1xf32, #tpu.memory_space<vmem>>, vector<256x1xf32>
    %c256 = arith.constant 256 : index
    %c0_1 = arith.constant 0 : index
    %1 = vector.load %arg6[%c256, %c0_1] : memref<769x1xf32, #tpu.memory_space<vmem>>, vector<256x1xf32>
    %c512 = arith.constant 512 : index
    %c0_2 = arith.constant 0 : index
    %2 = vector.load %arg6[%c512, %c0_2] : memref<769x1xf32, #tpu.memory_space<vmem>>, vector<256x1xf32>
    %c768 = arith.constant 768 : index
    %c0_3 = arith.constant 0 : index
    %3 = vector.load %arg6[%c768, %c0_3] : memref<769x1xf32, #tpu.memory_space<vmem>>, vector<1x1xf32>
    %c0_4 = arith.constant 0 : index
    %c0_5 = arith.constant 0 : index
    %4 = vector.load %arg2[%c0_4, %c0_5] : memref<256x16xbf16, #tpu.memory_space<vmem>>, vector<256x16xbf16>
    %c0_6 = arith.constant 0 : index
    %c0_7 = arith.constant 0 : index
    %5 = vector.load %arg1[%c0_6, %c0_7] : memref<16x128xf32, #tpu.memory_space<vmem>>, vector<16x128xf32>
    %6 = arith.truncf %5 : vector<16x128xf32> to vector<16x128xbf16>
    %cst = arith.constant dense<0.000000e+00> : vector<256x128xf32>
    %7 = tpu.matmul %4, %6, %cst {dimension_numbers = #tpu.dot_dimension_numbers<[1], [0], [0], [1], [0, 0, 1, 1], [], []>} : vector<256x16xbf16>, vector<16x128xbf16>, vector<256x128xf32> -> vector<256x128xf32>
    %8 = vector.broadcast %0 : vector<256x1xf32> to vector<256x128xf32>
    %9 = arith.addf %7, %8 : vector<256x128xf32>
    %cst_8 = arith.constant 0.000000e+00 : f32
    %10 = vector.broadcast %cst_8 : f32 to vector<256x128xf32>
    %11 = arith.maximumf %9, %10 : vector<256x128xf32>
    %c0_9 = arith.constant 0 : index
    %c0_10 = arith.constant 0 : index
    %12 = vector.load %arg3[%c0_9, %c0_10] : memref<256x256xbf16, #tpu.memory_space<vmem>>, vector<256x256xbf16>
    %13 = arith.truncf %11 : vector<256x128xf32> to vector<256x128xbf16>
    %cst_11 = arith.constant dense<0.000000e+00> : vector<256x128xf32>
    %14 = tpu.matmul %12, %13, %cst_11 {dimension_numbers = #tpu.dot_dimension_numbers<[1], [0], [0], [1], [0, 0, 1, 1], [], []>} : vector<256x256xbf16>, vector<256x128xbf16>, vector<256x128xf32> -> vector<256x128xf32>
    %15 = vector.broadcast %1 : vector<256x1xf32> to vector<256x128xf32>
    %16 = arith.addf %14, %15 : vector<256x128xf32>
    %cst_12 = arith.constant 0.000000e+00 : f32
    %17 = vector.broadcast %cst_12 : f32 to vector<256x128xf32>
    %18 = arith.maximumf %16, %17 : vector<256x128xf32>
    %c0_13 = arith.constant 0 : index
    %c0_14 = arith.constant 0 : index
    %19 = vector.load %arg4[%c0_13, %c0_14] : memref<256x256xbf16, #tpu.memory_space<vmem>>, vector<256x256xbf16>
    %20 = arith.truncf %18 : vector<256x128xf32> to vector<256x128xbf16>
    %cst_15 = arith.constant dense<0.000000e+00> : vector<256x128xf32>
    %21 = tpu.matmul %19, %20, %cst_15 {dimension_numbers = #tpu.dot_dimension_numbers<[1], [0], [0], [1], [0, 0, 1, 1], [], []>} : vector<256x256xbf16>, vector<256x128xbf16>, vector<256x128xf32> -> vector<256x128xf32>
    %22 = vector.broadcast %2 : vector<256x1xf32> to vector<256x128xf32>
    %23 = arith.addf %21, %22 : vector<256x128xf32>
    %cst_16 = arith.constant 0.000000e+00 : f32
    %24 = vector.broadcast %cst_16 : f32 to vector<256x128xf32>
    %25 = arith.maximumf %23, %24 : vector<256x128xf32>
    %c0_17 = arith.constant 0 : index
    %c0_18 = arith.constant 0 : index
    %26 = vector.load %arg5[%c0_17, %c0_18] : memref<1x256xbf16, #tpu.memory_space<vmem>>, vector<1x256xbf16>
    %27 = arith.truncf %25 : vector<256x128xf32> to vector<256x128xbf16>
    %cst_19 = arith.constant dense<0.000000e+00> : vector<1x128xf32>
    %28 = tpu.matmul %26, %27, %cst_19 {dimension_numbers = #tpu.dot_dimension_numbers<[1], [0], [0], [1], [0, 0, 1, 1], [], []>} : vector<1x256xbf16>, vector<256x128xbf16>, vector<1x128xf32> -> vector<1x128xf32>
    %29 = vector.broadcast %3 : vector<1x1xf32> to vector<1x128xf32>
    %30 = arith.addf %28, %29 : vector<1x128xf32>
    %c0_20 = arith.constant 0 : index
    %c0_21 = arith.constant 0 : index
    %31 = vector.load %arg7[%c0_20, %c0_21] : memref<1x128xf32, #tpu.memory_space<vmem>>, vector<1x128xf32>
    tpu.vector_store %arg7[%c0_20, %c0_21], %30 {strides = array<i32>} : memref<1x128xf32, #tpu.memory_space<vmem>>, vector<1x128xf32>,
    return
  }
  func.func @transform_0(%arg0: i32) -> (i32, i32) {
    %c0_i32 = arith.constant 0 : i32
    %c0_i32_0 = arith.constant 0 : i32
    return %c0_i32, %arg0 : i32, i32
  }
  func.func @transform_1(%arg0: i32) -> (i32, i32) {
    %c0_i32 = arith.constant 0 : i32
    %c0_i32_0 = arith.constant 0 : i32
    %c0_i32_1 = arith.constant 0 : i32
    return %c0_i32, %c0_i32_0 : i32, i32
  }
  func.func @transform_2(%arg0: i32) -> (i32, i32) {
    %c0_i32 = arith.constant 0 : i32
    %c0_i32_0 = arith.constant 0 : i32
    %c0_i32_1 = arith.constant 0 : i32
    return %c0_i32, %c0_i32_0 : i32, i32
  }
  func.func @transform_3(%arg0: i32) -> (i32, i32) {
    %c0_i32 = arith.constant 0 : i32
    %c0_i32_0 = arith.constant 0 : i32
    %c0_i32_1 = arith.constant 0 : i32
    return %c0_i32, %c0_i32_0 : i32, i32
  }
  func.func @transform_4(%arg0: i32) -> (i32, i32) {
    %c0_i32 = arith.constant 0 : i32
    %c0_i32_0 = arith.constant 0 : i32
    %c0_i32_1 = arith.constant 0 : i32
    return %c0_i32, %c0_i32_0 : i32, i32
  }
  func.func @transform_5(%arg0: i32) -> (i32, i32) {
    %c0_i32 = arith.constant 0 : i32
    %c0_i32_0 = arith.constant 0 : i32
    %c0_i32_1 = arith.constant 0 : i32
    return %c0_i32, %c0_i32_0 : i32, i32
  }
  func.func @transform_6(%arg0: i32) -> (i32, i32) {
    %c0_i32 = arith.constant 0 : i32
    %c0_i32_0 = arith.constant 0 : i32
    return %c0_i32, %arg0 : i32, i32
  }
}

</mosaic_0001>

<bundles_post_ra>
// kernel: tpu_custom_call.1
= control target key start
LH: loop header
LB: loop body
LE: loop exit
PB: predicated region body
PF: predicated region fallthrough
CT: control target
= control target key end

     0   :  { %v2400_v3 = vmov 0   ;;  %vm397_vm0 = vcmask 130048   ;;  %s3228_s0 = inlined_call_operand.vmem [shape: f32[16,128], index: 0, kind: input, shape index: {}]   ;;  %s3229_s1 = inlined_call_operand.vmem [shape: bf16[256,16], index: 1, kind: input, shape index: {}]   ;;  %s3230_s2 = inlined_call_operand.vmem [shape: bf16[256,256], index: 2, kind: input, shape index: {}]   ;;  %s3231_s3 = inlined_call_operand.vmem [shape: bf16[256,256], index: 3, kind: input, shape index: {}]   ;;  %s3232_s4 = inlined_call_operand.vmem [shape: bf16[1,256], index: 4, kind: input, shape index: {}]   ;;  %s3233_s5 = inlined_call_operand.vmem [shape: f32[769,1], index: 5, kind: input, shape index: {}]   ;;  %s3234_s6 = inlined_call_operand.hbm [shape: f32[1,128], index: 6, kind: output, shape index: {}]  }
   0x1   :  { %v41_v0 = vld [vmem:[%s3233_s5 + $0x80] sm:$0xff]  ;;  %2263 = vset.pattern.permute.xlu1 %v2400_v3  ;;  %2262 = vset.pattern.permute.xlu0 %v2400_v3  ;;  %v155_v4 = vld [vmem:[%s3228_s0 + $0x8] sm:$0xff]  ;;  %v43_v12 = vld [vmem:[%s3233_s5 + $0x90] sm:$0xff] }
   0x2   :  { %v25_v1 = vld [vmem:[%s3233_s5] sm:$0xff]  ;;  %239 = vperm.xlu0 %2262, %v41_v0   ;;  %v42_v8 = vld [vmem:[%s3233_s5 + $0x88] sm:$0xff]  ;;  %v2268_v13 = vld [vmem:[%s3229_s1 + $0x10] sm:$0xff]  }
   0x3   :  { %v154_v2 = vld [vmem:[%s3228_s0] sm:$0xff]  ;;  %159 = vperm.xlu1 %2263, %v25_v1   ;;  %v26_v9 = vld [vmem:[%s3233_s5 + $0x8] sm:$0xff]  ;;  %v44_v14 = vld [vmem:[%s3233_s5 + $0x98] sm:$0xff] }
   0x4   :  { %v156_v5 = vpack.c.bf16 %v155_v4, %v154_v2  ;;  %v2264_v6 = vld [vmem:[%s3229_s1] sm:$0xff]   ;;  %v2266_v10 = vld [vmem:[%s3229_s1 + $0x8] sm:$0xff]   ;;  %v2269_v15 = vld [vmem:[%s3229_s1 + $0x50] sm:$0xff]  }
   0x5   :  { %v2265_v7 = vld [vmem:[%s3229_s1 + $0x40] sm:$0xff]   ;;  %v2267_v11 = vld [vmem:[%s3229_s1 + $0x48] sm:$0xff]   ;;  %2225 = vmatprep.mubr.msk.bf16.mxu0 %vm397_vm0, %v2264_v6  ;;  %v27_v16 = vld [vmem:[%s3233_s5 + $0x10] sm:$0xff] }
   0x6   :  { %2223 = vmatprep.subr.bf16.mxu0 %v156_v5  ;;  %2257 = vmatprep.subr.bf16.mxu1 %v156_v5  ;;  %v28_v17 = vld [vmem:[%s3233_s5 + $0x18] sm:$0xff]  ;;  %v2272_v20 = vld [vmem:[%s3229_s1 + $0x20] sm:$0xff]   ;;  %v46_v23 = vld [vmem:[%s3233_s5 + $0xa8] sm:$0xff] }
   0x7   :  { %2224 = vmatpush3.bf16.msra.mxu0 %v156_v5  ;;  %2258 = vmatpush3.bf16.msra.mxu1 %v156_v5  ;;  %v2270_v18 = vld [vmem:[%s3229_s1 + $0x18] sm:$0xff]   ;;  %v2273_v21 = vld [vmem:[%s3229_s1 + $0x60] sm:$0xff]   ;;  %v30_v25 = vld [vmem:[%s3233_s5 + $0x28] sm:$0xff] }
   0x8   :  { %2241 = vmatprep.mubr.msk.bf16.mxu1 %vm397_vm0, %v2265_v7  ;;  %244 = vperm.xlu0 %2262, %v42_v8   ;;  %v2271_v19 = vld [vmem:[%s3229_s1 + $0x58] sm:$0xff]   ;;  %v45_v22 = vld [vmem:[%s3233_s5 + $0xa0] sm:$0xff]  ;;  %v2274_v26 = vld [vmem:[%s3229_s1 + $0x28] sm:$0xff]  }
   0x9   :  { %164 = vperm.xlu1 %2263, %v26_v9   ;;  %v29_v24 = vld [vmem:[%s3233_s5 + $0x20] sm:$0xff]  ;;  %v2275_v27 = vld [vmem:[%s3229_s1 + $0x68] sm:$0xff]   ;;  %v2276_v28 = vld [vmem:[%s3229_s1 + $0x30] sm:$0xff]  }
   0xa   :  { %2226 = vmatmul.mubr.msk.bf16.vlgmr.msra.gmra.mrb[0].mxu0 %vm397_vm0, %v2266_v10  ;;  %2242 = vmatmul.mubr.msk.bf16.vlgmr.msra.gmra.mrb[0].mxu1 %vm397_vm0, %v2267_v11  ;;  %v2277_v29 = vld [vmem:[%s3229_s1 + $0x70] sm:$0xff]   ;;  %v48_v31 = vld [vmem:[%s3233_s5 + $0xb8] sm:$0xff]  ;;  %v49_v36 = vld [vmem:[%s3233_s5 + $0xc0] sm:$0xff] }
   0xb   :  { %2229 = vmatprep.mubr.msk.bf16.mxu0 %vm397_vm0, %v2268_v13  ;;  %2245 = vmatprep.mubr.msk.bf16.mxu1 %vm397_vm0, %v2269_v15  ;;  %v47_v30 = vld [vmem:[%s3233_s5 + $0xb0] sm:$0xff]  ;;  %v32_v33 = vld [vmem:[%s3233_s5 + $0x38] sm:$0xff]  ;;  %v50_v37 = vld [vmem:[%s3233_s5 + $0xc8] sm:$0xff] }
   0xc   :  { %249 = vperm.xlu0 %2262, %v43_v12   ;;  %v31_v32 = vld [vmem:[%s3233_s5 + $0x30] sm:$0xff]  ;;  %v2278_v34 = vld [vmem:[%s3229_s1 + $0x38] sm:$0xff]   ;;  %v33_v38 = vld [vmem:[%s3233_s5 + $0x40] sm:$0xff] }
   0xd   :  { %254 = vperm.xlu1 %2263, %v44_v14   ;;  %v2279_v35 = vld [vmem:[%s3229_s1 + $0x78] sm:$0xff]   ;;  %v34_v39 = vld [vmem:[%s3233_s5 + $0x48] sm:$0xff]  ;;  %v51_v40 = vld [vmem:[%s3233_s5 + $0xd0] sm:$0xff] }
   0xe   :  { %v52_v41 = vld [vmem:[%s3233_s5 + $0xd8] sm:$0xff]  ;;  %v35_v42 = vld [vmem:[%s3233_s5 + $0x50] sm:$0xff]  ;;  %v53_v44 = vld [vmem:[%s3233_s5 + $0xe0] sm:$0xff] }
   0xf   :  { %v36_v43 = vld [vmem:[%s3233_s5 + $0x58] sm:$0xff]  ;;  %v54_v45 = vld [vmem:[%s3233_s5 + $0xe8] sm:$0xff]  ;;  %v37_v46 = vld [vmem:[%s3233_s5 + $0x60] sm:$0xff] }
  0x10   :  { %169 = vperm.xlu0 %2262, %v27_v16   ;;  %v38_v47 = vld [vmem:[%s3233_s5 + $0x68] sm:$0xff]  ;;  %v55_v48 = vld [vmem:[%s3233_s5 + $0xf0] sm:$0xff]  ;;  %v56_v49 = vld [vmem:[%s3233_s5 + $0xf8] sm:$0xff] }
  0x11   :  { %174 = vperm.xlu1 %2263, %v28_v17   ;;  %v39_v50 = vld [vmem:[%s3233_s5 + $0x70] sm:$0xff]  ;;  %v40_v51 = vld [vmem:[%s3233_s5 + $0x78] sm:$0xff]  ;;  %v73_v52 = vld [vmem:[%s3233_s5 + $0x180] sm:$0xff] }
  0x12   :  { %2230 = vmatmul.mubr.msk.bf16.gmra.mrb[4].mxu0 %vm397_vm0, %v2270_v18  ;;  %2246 = vmatmul.mubr.msk.bf16.gmra.mrb[4].mxu1 %vm397_vm0, %v2271_v19  ;;  %v74_v53 = vld [vmem:[%s3233_s5 + $0x188] sm:$0xff]  ;;  %v57_v54 = vld [vmem:[%s3233_s5 + $0x100] sm:$0xff] }
  0x13   :  { %2233 = vmatprep.mubr.msk.bf16.mxu0 %vm397_vm0, %v2272_v20  ;;  %2249 = vmatprep.mubr.msk.bf16.mxu1 %vm397_vm0, %v2273_v21  ;;  %v58_v55 = vld [vmem:[%s3233_s5 + $0x108] sm:$0xff] }
  0x14   :  { %259 = vperm.xlu0 %2262, %v45_v22  }
  0x15   :  { %264 = vperm.xlu1 %2263, %v46_v23  }
  0x18   :  { %179 = vperm.xlu0 %2262, %v29_v24  }
  0x19   :  { %184 = vperm.xlu1 %2263, %v30_v25  }
  0x1a   :  { %2234 = vmatmul.mubr.msk.bf16.gmra.mrb[8].mxu0 %vm397_vm0, %v2274_v26  ;;  %2250 = vmatmul.mubr.msk.bf16.gmra.mrb[8].mxu1 %vm397_vm0, %v2275_v27 }
  0x1b   :  { %2237 = vmatprep.mubr.msk.bf16.mxu0 %vm397_vm0, %v2276_v28  ;;  %2253 = vmatprep.mubr.msk.bf16.mxu1 %vm397_vm0, %v2277_v29 }
  0x1c   :  { %269 = vperm.xlu0 %2262, %v47_v30  }
  0x1d   :  { %274 = vperm.xlu1 %2263, %v48_v31  }
  0x20   :  { %189 = vperm.xlu0 %2262, %v31_v32  }
  0x21   :  { %194 = vperm.xlu1 %2263, %v32_v33  }
  0x22   :  { %2238 = vmatmul.mubr.msk.bf16.gmra.mrb[12].mxu0 %vm397_vm0, %v2278_v34  ;;  %2254 = vmatmul.mubr.msk.bf16.gmra.mrb[12].mxu1 %vm397_vm0, %v2279_v35 }
  0x24   :  { %279 = vperm.xlu0 %2262, %v49_v36  }
  0x25   :  { %284 = vperm.xlu1 %2263, %v50_v37  }
  0x28   :  { %199 = vperm.xlu0 %2262, %v33_v38  }
  0x29   :  { %204 = vperm.xlu1 %2263, %v34_v39  }
  0x2c   :  { %289 = vperm.xlu0 %2262, %v51_v40  }
  0x2d   :  { %294 = vperm.xlu1 %2263, %v52_v41  }
  0x30   :  { %209 = vperm.xlu0 %2262, %v35_v42  }
  0x31   :  { %214 = vperm.xlu1 %2263, %v36_v43  }
  0x34   :  { %299 = vperm.xlu0 %2262, %v53_v44  }
  0x35   :  { %304 = vperm.xlu1 %2263, %v54_v45  }
  0x38   :  { %219 = vperm.xlu0 %2262, %v37_v46  }
  0x39   :  { %224 = vperm.xlu1 %2263, %v38_v47  }
  0x3c   :  { %309 = vperm.xlu0 %2262, %v55_v48  }
  0x3d   :  { %314 = vperm.xlu1 %2263, %v56_v49  }
  0x40   :  { %229 = vperm.xlu0 %2262, %v39_v50  }
  0x41   :  { %234 = vperm.xlu1 %2263, %v40_v51  }
  0x44   :  { %769 = vperm.xlu0 %2262, %v73_v52  }
  0x45   :  { %774 = vperm.xlu1 %2263, %v74_v53  }
  0x46   :  { %11 = vsyncpa [#allocation3], 0  ;;  %v75_v56 = vld [vmem:[%s3233_s5 + $0x190] sm:$0xff]  ;;  %v76_v57 = vld [vmem:[%s3233_s5 + $0x198] sm:$0xff] }
  0x47   :  { %v59_v58 = vld [vmem:[%s3233_s5 + $0x110] sm:$0xff]  ;;  %v60_v59 = vld [vmem:[%s3233_s5 + $0x118] sm:$0xff]  ;;  %v77_v60 = vld [vmem:[%s3233_s5 + $0x1a0] sm:$0xff] }
  0x48   :  { %689 = vperm.xlu0 %2262, %v57_v54   ;;  %v78_v61 = vld [vmem:[%s3233_s5 + $0x1a8] sm:$0xff]  ;;  %v61_v62 = vld [vmem:[%s3233_s5 + $0x120] sm:$0xff]  ;;  %v79_v0 = vld [vmem:[%s3233_s5 + $0x1b0] sm:$0xff] }
  0x49   :  { %694 = vperm.xlu1 %2263, %v58_v55   ;;  %v62_v63 = vld [vmem:[%s3233_s5 + $0x128] sm:$0xff]  ;;  %v80_v1 = vld [vmem:[%s3233_s5 + $0x1b8] sm:$0xff]  ;;  %v63_v2 = vld [vmem:[%s3233_s5 + $0x130] sm:$0xff] }
  0x4a   :  { %v64_v3 = vld [vmem:[%s3233_s5 + $0x138] sm:$0xff]  ;;  %v81_v4 = vld [vmem:[%s3233_s5 + $0x1c0] sm:$0xff]  ;;  %v82_v5 = vld [vmem:[%s3233_s5 + $0x1c8] sm:$0xff] }
  0x4b   :  { %v65_v6 = vld [vmem:[%s3233_s5 + $0x140] sm:$0xff]  ;;  %v66_v7 = vld [vmem:[%s3233_s5 + $0x148] sm:$0xff]  ;;  %v83_v8 = vld [vmem:[%s3233_s5 + $0x1d0] sm:$0xff] }
  0x4c   :  { %779 = vperm.xlu0 %2262, %v75_v56   ;;  %v84_v9 = vld [vmem:[%s3233_s5 + $0x1d8] sm:$0xff]  ;;  %v67_v10 = vld [vmem:[%s3233_s5 + $0x150] sm:$0xff]  ;;  %v85_v12 = vld [vmem:[%s3233_s5 + $0x1e0] sm:$0xff] }
  0x4d   :  { %784 = vperm.xlu1 %2263, %v76_v57   ;;  %v68_v11 = vld [vmem:[%s3233_s5 + $0x158] sm:$0xff]  ;;  %v86_v13 = vld [vmem:[%s3233_s5 + $0x1e8] sm:$0xff]  ;;  %v69_v14 = vld [vmem:[%s3233_s5 + $0x160] sm:$0xff] }
  0x4e   :  { %v70_v15 = vld [vmem:[%s3233_s5 + $0x168] sm:$0xff]  ;;  %v87_v16 = vld [vmem:[%s3233_s5 + $0x1f0] sm:$0xff]  ;;  %v88_v17 = vld [vmem:[%s3233_s5 + $0x1f8] sm:$0xff] }
  0x4f   :  { %v71_v18 = vld [vmem:[%s3233_s5 + $0x170] sm:$0xff]  ;;  %v72_v19 = vld [vmem:[%s3233_s5 + $0x178] sm:$0xff]  ;;  %v105_v20 = vld [vmem:[%s3233_s5 + $0x280] sm:$0xff] }
  0x50   :  { %699 = vperm.xlu0 %2262, %v59_v58   ;;  %v106_v21 = vld [vmem:[%s3233_s5 + $0x288] sm:$0xff]  ;;  %v89_v22 = vld [vmem:[%s3233_s5 + $0x200] sm:$0xff]  ;;  %v107_v25 = vld [vmem:[%s3233_s5 + $0x290] sm:$0xff] }
  0x51   :  { %704 = vperm.xlu1 %2263, %v60_v59   ;;  %v90_v23 = vld [vmem:[%s3233_s5 + $0x208] sm:$0xff]  ;;  %v108_v26 = vld [vmem:[%s3233_s5 + $0x298] sm:$0xff]  ;;  %v91_v27 = vld [vmem:[%s3233_s5 + $0x210] sm:$0xff] }
  0x52   :  { %v2282_v24 = vld [vmem:[%s3230_s2 + $0x4] ss:$8 sps:$4 sm:$0xff]   ;;  %v92_v28 = vld [vmem:[%s3233_s5 + $0x218] sm:$0xff]  ;;  %v111_v37 = vld [vmem:[%s3233_s5 + $0x2b0] sm:$0xff] }
  0x53   :  { %1039 = vmatprep.mubr.bf16.mxu1 %v2282_v24  ;;  %v109_v29 = vld [vmem:[%s3233_s5 + $0x2a0] sm:$0xff]  ;;  %v110_v30 = vld [vmem:[%s3233_s5 + $0x2a8] sm:$0xff]  ;;  %v112_v38 = vld [vmem:[%s3233_s5 + $0x2b8] sm:$0xff] }
  0x54   :  { %789 = vperm.xlu0 %2262, %v77_v60   ;;  %v93_v33 = vld [vmem:[%s3233_s5 + $0x220] sm:$0xff]  ;;  %v94_v34 = vld [vmem:[%s3233_s5 + $0x228] sm:$0xff]  ;;  %v95_v39 = vld [vmem:[%s3233_s5 + $0x230] sm:$0xff] }
  0x55   :  { %794 = vperm.xlu1 %2263, %v78_v61   ;;  %v96_v40 = vld [vmem:[%s3233_s5 + $0x238] sm:$0xff]  ;;  %v113_v43 = vld [vmem:[%s3233_s5 + $0x2c0] sm:$0xff]  ;;  %v114_v44 = vld [vmem:[%s3233_s5 + $0x2c8] sm:$0xff] }
  0x56   :  { %v97_v47 = vld [vmem:[%s3233_s5 + $0x240] sm:$0xff]  ;;  %v98_v48 = vld [vmem:[%s3233_s5 + $0x248] sm:$0xff]  ;;  %v115_v49 = vld [vmem:[%s3233_s5 + $0x2d0] sm:$0xff] }
  0x57   :  { %v116_v50 = vld [vmem:[%s3233_s5 + $0x2d8] sm:$0xff]  ;;  %v99_v53 = vld [vmem:[%s3233_s5 + $0x250] sm:$0xff]  ;;  %v117_v57 = vld [vmem:[%s3233_s5 + $0x2e0] sm:$0xff] }
  0x58   :  { %709 = vperm.xlu0 %2262, %v61_v62   ;;  %v100_v54 = vld [vmem:[%s3233_s5 + $0x258] sm:$0xff]  ;;  %v118_v58 = vld [vmem:[%s3233_s5 + $0x2e8] sm:$0xff]  ;;  %v101_v59 = vld [vmem:[%s3233_s5 + $0x260] sm:$0xff] }
  0x59   :  { %714 = vperm.xlu1 %2263, %v62_v63   ;;  %v102_v60 = vld [vmem:[%s3233_s5 + $0x268] sm:$0xff]  ;;  %v119_v63 = vld [vmem:[%s3233_s5 + $0x2f0] sm:$0xff] }
  0x5c   :  { %799 = vperm.xlu0 %2262, %v79_v0   ;;  %v120_v0 = vld [vmem:[%s3233_s5 + $0x2f8] sm:$0xff] }
  0x5d   :  { %804 = vperm.xlu1 %2263, %v80_v1  }
  0x60   :  { %719 = vperm.xlu0 %2262, %v63_v2  }
  0x61   :  { %724 = vperm.xlu1 %2263, %v64_v3   ;;  %v103_v3 = vld [vmem:[%s3233_s5 + $0x270] sm:$0xff] }
  0x64   :  { %809 = vperm.xlu0 %2262, %v81_v4   ;;  %v104_v4 = vld [vmem:[%s3233_s5 + $0x278] sm:$0xff] }
  0x65   :  { %814 = vperm.xlu1 %2263, %v82_v5   ;;  %v121_v5 = vld [vmem:[%s3233_s5 + $0x300] sm:$0x1] }
  0x68   :  { %729 = vperm.xlu0 %2262, %v65_v6  }
  0x69   :  { %734 = vperm.xlu1 %2263, %v66_v7  }
  0x6c   :  { %819 = vperm.xlu0 %2262, %v83_v8  }
  0x6d   :  { %824 = vperm.xlu1 %2263, %v84_v9  }
  0x70   :  { %739 = vperm.xlu0 %2262, %v67_v10  }
  0x71   :  { %744 = vperm.xlu1 %2263, %v68_v11  }
  0x74   :  { %829 = vperm.xlu0 %2262, %v85_v12  }
  0x75   :  { %834 = vperm.xlu1 %2263, %v86_v13  }
  0x78   :  { %749 = vperm.xlu0 %2262, %v69_v14  }
  0x79   :  { %754 = vperm.xlu1 %2263, %v70_v15  }
  0x7c   :  { %839 = vperm.xlu0 %2262, %v87_v16  }
  0x7d   :  { %844 = vperm.xlu1 %2263, %v88_v17  }
  0x80   :  { %759 = vperm.xlu0 %2262, %v71_v18  }
  0x81   :  { %764 = vperm.xlu1 %2263, %v72_v19   ;;  %v2733_v31 = vpop.permute.xlu0 %239 }
  0x82   :  { %v2735_v32 = vpop.permute.xlu1 %159 }
  0x84   :  { %1330 = vperm.xlu0 %2262, %v105_v20  }
  0x85   :  { %1335 = vperm.xlu1 %2263, %v106_v21  }
  0x87   :  { %v2743_v35 = vpop.permute.xlu0 %244 }
  0x88   :  { %1250 = vperm.xlu0 %2262, %v89_v22   ;;  %v2745_v36 = vpop.permute.xlu1 %164 }
  0x89   :  { %1255 = vperm.xlu1 %2263, %v90_v23  }
  0x8b   :  { %v250_v41 = vpop.permute.xlu0 %249 }
  0x8c   :  { %1340 = vperm.xlu0 %2262, %v107_v25   ;;  %v2759_v42 = vpop.permute.xlu1 %254 }
  0x8d   :  { %1345 = vperm.xlu1 %2263, %v108_v26  }
  0x8f   :  { %v170_v45 = vpop.permute.xlu0 %169 }
  0x90   :  { %1260 = vperm.xlu0 %2262, %v91_v27   ;;  %v175_v46 = vpop.permute.xlu1 %174 }
  0x91   :  { %1265 = vperm.xlu1 %2263, %v92_v28  }
  0x93   :  { %v2779_v51 = vpop.permute.xlu0 %259 }
  0x94   :  { %1350 = vperm.xlu0 %2262, %v109_v29   ;;  %v2781_v52 = vpop.permute.xlu1 %264 }
  0x95   :  { %1355 = vperm.xlu1 %2263, %v110_v30  }
  0x97   :  { %v2789_v55 = vpop.permute.xlu0 %179 }
  0x98   :  { %1270 = vperm.xlu0 %2262, %v93_v33   ;;  %v2791_v56 = vpop.permute.xlu1 %184 }
  0x99   :  { %1275 = vperm.xlu1 %2263, %v94_v34  }
  0x9b   :  { %v270_v61 = vpop.permute.xlu0 %269 }
  0x9c   :  { %1360 = vperm.xlu0 %2262, %v111_v37   ;;  %v2805_v62 = vpop.permute.xlu1 %274 }
  0x9d   :  { %1365 = vperm.xlu1 %2263, %v112_v38  }
  0x9f   :  { %v190_v1 = vpop.permute.xlu0 %189 }
  0xa0   :  { %1280 = vperm.xlu0 %2262, %v95_v39   ;;  %v195_v2 = vpop.permute.xlu1 %194 }
  0xa1   :  { %1285 = vperm.xlu1 %2263, %v96_v40  }
  0xa3   :  { %v2822_v6 = vpop.permute.xlu0 %279 }
  0xa4   :  { %1370 = vperm.xlu0 %2262, %v113_v43   ;;  %v2824_v7 = vpop.permute.xlu1 %284 }
  0xa5   :  { %1375 = vperm.xlu1 %2263, %v114_v44  }
  0xa7   :  { %v2826_v8 = vpop.permute.xlu0 %199 }
  0xa8   :  { %1290 = vperm.xlu0 %2262, %v97_v47   ;;  %v2828_v9 = vpop.permute.xlu1 %204 }
  0xa9   :  { %1295 = vperm.xlu1 %2263, %v98_v48  }
  0xab   :  { %v2830_v10 = vpop.permute.xlu0 %289 }
  0xac   :  { %1380 = vperm.xlu0 %2262, %v115_v49   ;;  %v2832_v11 = vpop.permute.xlu1 %294 }
  0xad   :  { %1385 = vperm.xlu1 %2263, %v116_v50  }
  0xaf   :  { %v2834_v12 = vpop.permute.xlu0 %209 }
  0xb0   :  { %1300 = vperm.xlu0 %2262, %v99_v53   ;;  %v2836_v13 = vpop.permute.xlu1 %214 }
  0xb1   :  { %1305 = vperm.xlu1 %2263, %v100_v54  }
  0xb3   :  { %v2838_v14 = vpop.permute.xlu0 %299 }
  0xb4   :  { %1390 = vperm.xlu0 %2262, %v117_v57   ;;  %v2840_v15 = vpop.permute.xlu1 %304 }
  0xb5   :  { %1395 = vperm.xlu1 %2263, %v118_v58  }
  0xb8   :  { %1310 = vperm.xlu0 %2262, %v101_v59  }
  0xb9   :  { %1315 = vperm.xlu1 %2263, %v102_v60  }
  0xbc   :  { %1400 = vperm.xlu0 %2262, %v119_v63  }
  0xbd   :  { %1405 = vperm.xlu1 %2263, %v120_v0  }
  0xc0   :  { %1320 = vperm.xlu0 %2262, %v103_v3  }
  0xc1   :  { %1325 = vperm.xlu1 %2263, %v104_v4  }
  0xc4   :  { %1780 = vperm.xlu0 %2262, %v121_v5  }
  0xdd   :  { %v2227_v16 = vpop.f32.mrb[0].mxu0  ;;  %v2243_v17 = vpop.f32.mrb[0].mxu1 }
  0xde   :  { %v489_v18 = vadd.f32 %v2227_v16, %v170_v45  ;;  %v553_v19 = vadd.f32 %v2243_v17, %v250_v41  ;;  %v480_v20 = vpop.f32.mrb[1].mxu0  ;;  %v544_v21 = vpop.f32.mrb[1].mxu1 }
  0xdf   :  { %v481_v22 = vadd.f32 %v480_v20, %v2735_v32  ;;  %v545_v23 = vadd.f32 %v544_v21, %v2733_v31  ;;  %v2228_v24 = vpop.f32.mrb[2].mxu0  ;;  %v2244_v25 = vpop.f32.mrb[2].mxu1 }
  0xe0   :  { %v492_v26 = vadd.f32 %v2228_v24, %v175_v46  ;;  %v556_v27 = vadd.f32 %v2244_v25, %v2759_v42  ;;  %v483_v28 = vpop.f32.mrb[3].mxu0  ;;  %v547_v29 = vpop.f32.mrb[3].mxu1  ;;  %v609_v34 = vmax.f32 %v489_v18, 0.0  ;;  %v625_v37 = vmax.f32 %v553_v19, 0.0 }
  0xe1   :  { %v484_v30 = vadd.f32 %v483_v28, %v2745_v36  ;;  %v548_v33 = vadd.f32 %v547_v29, %v2743_v35  ;;  %v607_v40 = vmax.f32 %v481_v22, 0.0  ;;  %v623_v41 = vmax.f32 %v545_v23, 0.0  ;;  %v2847_v45 = vpop.permute.xlu0 %219  ;;  %v2849_v46 = vpop.permute.xlu1 %224 }
  0xe2   :  { %v610_v38 = vmax.f32 %v492_v26, 0.0  ;;  %v626_v39 = vmax.f32 %v556_v27, 0.0 }
  0xe3   :  { %v608_v32 = vmax.f32 %v484_v30, 0.0  ;;  %v624_v43 = vmax.f32 %v548_v33, 0.0 }
  0xe4   :  { %v672_v31 = vpack.c.bf16 %v610_v38, %v609_v34  ;;  %v680_v44 = vpack.c.bf16 %v626_v39, %v625_v37 }
  0xe5   :  { %v671_v42 = vpack.c.bf16 %v608_v32, %v607_v40  ;;  %v679_v47 = vpack.c.bf16 %v624_v43, %v623_v41  ;;  %v2231_v48 = vpop.f32.mrb[4].mxu0  ;;  %v2247_v36 = vpop.f32.mrb[4].mxu1 }
  0xe6   :  { %v505_v49 = vadd.f32 %v2231_v48, %v190_v1  ;;  %v569_v35 = vadd.f32 %v2247_v36, %v270_v61  ;;  %v496_v50 = vpop.f32.mrb[5].mxu0  ;;  %v560_v53 = vpop.f32.mrb[5].mxu1 }
  0xe7   :  { %1977 = vmatprep.subr.bf16.mxu1 %v679_v47  ;;  %v497_v54 = vadd.f32 %v496_v50, %v2789_v55  ;;  %v561_v57 = vadd.f32 %v560_v53, %v2779_v51  ;;  %v2232_v58 = vpop.f32.mrb[6].mxu0  ;;  %v2248_v59 = vpop.f32.mrb[6].mxu1 }
  0xe8   :  { %1978 = vmatpush3.bf16.msra.mxu1 %v671_v42  ;;  %v508_v60 = vadd.f32 %v2232_v58, %v195_v2  ;;  %v572_v63 = vadd.f32 %v2248_v59, %v2805_v62  ;;  %v499_v0 = vpop.f32.mrb[7].mxu0  ;;  %v563_v3 = vpop.f32.mrb[7].mxu1  ;;  %v613_v1 = vmax.f32 %v505_v49, 0.0  ;;  %v629_v5 = vmax.f32 %v569_v35, 0.0 }
  0xe9   :  { %1979 = vmatprep.subr.bf16.mxu1 %v680_v44  ;;  %v500_v4 = vadd.f32 %v499_v0, %v2791_v56  ;;  %v564_v61 = vadd.f32 %v563_v3, %v2781_v52  ;;  %v611_v55 = vmax.f32 %v497_v54, 0.0  ;;  %v627_v18 = vmax.f32 %v561_v57, 0.0  ;;  %v310_v22 = vpop.permute.xlu0 %309  ;;  %v315_v23 = vpop.permute.xlu1 %314 }
  0xea   :  { %v614_v16 = vmax.f32 %v508_v60, 0.0  ;;  %v630_v17 = vmax.f32 %v572_v63, 0.0 }
  0xeb   :  { %v612_v51 = vmax.f32 %v500_v4, 0.0  ;;  %v628_v19 = vmax.f32 %v564_v61, 0.0 }
  0xec   :  { %1980 = vmatpush3.bf16.msra.mxu1 %v672_v31  ;;  %v674_v20 = vpack.c.bf16 %v614_v16, %v613_v1  ;;  %v682_v2 = vpack.c.bf16 %v630_v17, %v629_v5 }
  0xed   :  { %v2235_v21 = vpop.f32.mrb[8].mxu0  ;;  %v2251_v62 = vpop.f32.mrb[8].mxu1  ;;  %v673_v24 = vpack.c.bf16 %v612_v51, %v611_v55  ;;  %v681_v25 = vpack.c.bf16 %v628_v19, %v627_v18 }
  0xee   :  { %v521_v56 = vadd.f32 %v2235_v21, %v2834_v12  ;;  %v585_v52 = vadd.f32 %v2251_v62, %v2830_v10  ;;  %v512_v26 = vpop.f32.mrb[9].mxu0  ;;  %v576_v27 = vpop.f32.mrb[9].mxu1  ;;  %v2285_v21 = vld [vmem:[%s3230_s2 + $0x10] ss:$8 sps:$4 sm:$0xff]   ;;  %v2286_v62 = vld [vmem:[%s3230_s2 + $0x24] ss:$8 sps:$4 sm:$0xff]  }
  0xef   :  { %v513_v28 = vadd.f32 %v512_v26, %v2826_v8  ;;  %v577_v29 = vadd.f32 %v576_v27, %v2822_v6  ;;  %v2236_v30 = vpop.f32.mrb[10].mxu0  ;;  %v2252_v33 = vpop.f32.mrb[10].mxu1  ;;  %1981 = vmatprep.subr.bf16.mxu1 %v681_v25  ;;  %v2292_v25 = vld [vmem:[%s3230_s2 + $0x44] ss:$8 sps:$4 sm:$0xff]   ;;  %v2297_v26 = vld [vmem:[%s3230_s2 + $0x50] ss:$8 sps:$4 sm:$0xff]  }
  0xf0   :  { %v524_v34 = vadd.f32 %v2236_v30, %v2836_v13  ;;  %v588_v37 = vadd.f32 %v2252_v33, %v2832_v11  ;;  %v515_v38 = vpop.f32.mrb[11].mxu0  ;;  %v579_v39 = vpop.f32.mrb[11].mxu1  ;;  %1982 = vmatpush3.bf16.msra.mxu1 %v673_v24  ;;  %v617_v40 = vmax.f32 %v521_v56, 0.0  ;;  %v633_v41 = vmax.f32 %v585_v52, 0.0  ;;  %v2291_v24 = vld [vmem:[%s3230_s2 + $0x30] ss:$8 sps:$4 sm:$0xff]  }
  0xf1   :  { %v516_v12 = vadd.f32 %v515_v38, %v2828_v9  ;;  %v580_v10 = vadd.f32 %v579_v39, %v2824_v7  ;;  %1983 = vmatprep.subr.bf16.mxu1 %v682_v2  ;;  %v615_v6 = vmax.f32 %v513_v28, 0.0  ;;  %v631_v43 = vmax.f32 %v577_v29, 0.0  ;;  %v230_v48 = vpop.permute.xlu0 %229  ;;  %v235_v36 = vpop.permute.xlu1 %234  ;;  %v2294_v56 = vld [vmem:[%s3230_s2 + $0x40] ss:$8 sps:$4 sm:$0xff]   ;;  %v2295_v52 = vld [vmem:[%s3230_s2 + $0x54] ss:$8 sps:$4 sm:$0xff]  }
  0xf2   :  { %v618_v8 = vmax.f32 %v524_v34, 0.0  ;;  %v634_v32 = vmax.f32 %v588_v37, 0.0  ;;  %v2298_v27 = vld [vmem:[%s3230_s2 + $0x64] ss:$8 sps:$4 sm:$0xff]   ;;  %v2300_v28 = vld [vmem:[%s3230_s2 + $0x60] ss:$8 sps:$4 sm:$0xff]  }
  0xf3   :  { %v616_v31 = vmax.f32 %v516_v12, 0.0  ;;  %v632_v44 = vmax.f32 %v580_v10, 0.0  ;;  %v2301_v29 = vld [vmem:[%s3230_s2 + $0x74] ss:$8 sps:$4 sm:$0xff]   ;;  %v2303_v30 = vld [vmem:[%s3230_s2 + $0x70] ss:$8 sps:$4 sm:$0xff]  }
  0xf4   :  { %v676_v42 = vpack.c.bf16 %v618_v8, %v617_v40  ;;  %v684_v13 = vpack.c.bf16 %v634_v32, %v633_v41  ;;  %1984 = vmatpush3.bf16.msra.mxu1 %v674_v20  ;;  %v2304_v33 = vld [vmem:[%s3230_s2 + $0x84] ss:$8 sps:$4 sm:$0xff]   ;;  %v2306_v34 = vld [vmem:[%s3230_s2 + $0x80] ss:$8 sps:$4 sm:$0xff]   ;;  %v2307_v37 = vld [vmem:[%s3230_s2 + $0x94] ss:$8 sps:$4 sm:$0xff]  }
  0xf5   :  { %v2239_v11 = vpop.f32.mrb[12].mxu0  ;;  %v2255_v47 = vpop.f32.mrb[12].mxu1  ;;  %v675_v49 = vpack.c.bf16 %v616_v31, %v615_v6  ;;  %v683_v9 = vpack.c.bf16 %v632_v44, %v631_v43  ;;  %v2309_v38 = vld [vmem:[%s3230_s2 + $0x90] ss:$8 sps:$4 sm:$0xff]   ;;  %v2310_v39 = vld [vmem:[%s3230_s2 + $0xa4] ss:$8 sps:$4 sm:$0xff]  }
  0xf6   :  { %v537_v35 = vadd.f32 %v2239_v11, %v230_v48  ;;  %v601_v7 = vadd.f32 %v2255_v47, %v310_v22  ;;  %v528_v50 = vpop.f32.mrb[13].mxu0  ;;  %v592_v53 = vpop.f32.mrb[13].mxu1  ;;  %v2288_v22 = vld [vmem:[%s3230_s2 + $0x20] ss:$8 sps:$4 sm:$0xff]   ;;  %v2313_v10 = vld [vmem:[%s3230_s2 + $0xb4] ss:$8 sps:$4 sm:$0xff]  }
  0xf7   :  { %v529_v54 = vadd.f32 %v528_v50, %v2847_v45  ;;  %v593_v57 = vadd.f32 %v592_v53, %v2838_v14  ;;  %v2240_v58 = vpop.f32.mrb[14].mxu0  ;;  %v2256_v59 = vpop.f32.mrb[14].mxu1  ;;  %1985 = vmatprep.subr.bf16.mxu1 %v683_v9  ;;  %v2312_v12 = vld [vmem:[%s3230_s2 + $0xa0] ss:$8 sps:$4 sm:$0xff]   ;;  %v2315_v40 = vld [vmem:[%s3230_s2 + $0xb0] ss:$8 sps:$4 sm:$0xff]  }
  0xf8   :  { %v540_v60 = vadd.f32 %v2240_v58, %v235_v36  ;;  %v604_v63 = vadd.f32 %v2256_v59, %v315_v23  ;;  %v531_v0 = vpop.f32.mrb[15].mxu0  ;;  %v595_v3 = vpop.f32.mrb[15].mxu1  ;;  %1986 = vmatpush3.bf16.msra.mxu1 %v675_v49  ;;  %v621_v1 = vmax.f32 %v537_v35, 0.0  ;;  %v637_v5 = vmax.f32 %v601_v7, 0.0  ;;  %v2289_v23 = vld [vmem:[%s3230_s2 + $0x34] ss:$8 sps:$4 sm:$0xff]  }
  0xf9   :  { %v532_v4 = vadd.f32 %v531_v0, %v2849_v46  ;;  %v596_v61 = vadd.f32 %v595_v3, %v2840_v15  ;;  %1987 = vmatprep.subr.bf16.mxu1 %v684_v13  ;;  %v619_v45 = vmax.f32 %v529_v54, 0.0  ;;  %v635_v55 = vmax.f32 %v593_v57, 0.0  ;;  %v2280_v15 = vld [vmem:[%s3230_s2] ss:$8 sps:$4 sm:$0xff]   ;;  %v2283_v46 = vld [vmem:[%s3230_s2 + $0x14] ss:$8 sps:$4 sm:$0xff]   ;;  %v2961_v13 = vpop.permute.xlu0 %769  ;;  %v2963_v11 = vpop.permute.xlu1 %774 }
  0xfa   :  { %v622_v16 = vmax.f32 %v540_v60, 0.0  ;;  %v638_v17 = vmax.f32 %v604_v63, 0.0  ;;  %v2316_v41 = vld [vmem:[%s3230_s2 + $0xc4] ss:$8 sps:$4 sm:$0xff]   ;;  %v2318_v8 = vld [vmem:[%s3230_s2 + $0xc0] ss:$8 sps:$4 sm:$0xff]  }
  0xfb   :  { %v620_v14 = vmax.f32 %v532_v4, 0.0  ;;  %v636_v18 = vmax.f32 %v596_v61, 0.0  ;;  %v2319_v32 = vld [vmem:[%s3230_s2 + $0xd4] ss:$8 sps:$4 sm:$0xff]   ;;  %v2321_v6 = vld [vmem:[%s3230_s2 + $0xd0] ss:$8 sps:$4 sm:$0xff]  }
  0xfc   :  { %v678_v51 = vpack.c.bf16 %v622_v16, %v621_v1  ;;  %v686_v19 = vpack.c.bf16 %v638_v17, %v637_v5  ;;  %1988 = vmatpush3.bf16.msra.mxu1 %v676_v42  ;;  %v2322_v43 = vld [vmem:[%s3230_s2 + $0xe4] ss:$8 sps:$4 sm:$0xff]   ;;  %v2324_v31 = vld [vmem:[%s3230_s2 + $0xe0] ss:$8 sps:$4 sm:$0xff]   ;;  %v2325_v44 = vld [vmem:[%s3230_s2 + $0xf4] ss:$8 sps:$4 sm:$0xff]  }
  0xfd   :  { %v677_v20 = vpack.c.bf16 %v620_v14, %v619_v45  ;;  %v685_v2 = vpack.c.bf16 %v636_v18, %v635_v55  ;;  %v2327_v42 = vld [vmem:[%s3230_s2 + $0xf0] ss:$8 sps:$4 sm:$0xff]   ;;  %v690_v47 = vpop.permute.xlu0 %689  ;;  %v695_v48 = vpop.permute.xlu1 %694  ;;  %v2330_v61 = vld [vmem:[%s3231_s3 + $0x4] ss:$8 sps:$4 sm:$0xff]  }
  0xfe   :  { %1600 = vmatprep.mubr.bf16.mxu0 %v2330_v61 }
  0xff   :  { %1989 = vmatprep.subr.bf16.mxu1 %v685_v2 }
 0x100   :  { %1990 = vmatpush3.bf16.msra.mxu1 %v677_v20 }
 0x101   :  { %1991 = vmatprep.subr.bf16.mxu1 %v686_v19  ;;  %v2965_v36 = vpop.permute.xlu0 %779  ;;  %v2967_v49 = vpop.permute.xlu1 %784 }
 0x104   :  { %1992 = vmatpush3.bf16.msra.mxu1 %v678_v51 }
 0x105   :  { %v700_v9 = vpop.permute.xlu0 %699  ;;  %v705_v35 = vpop.permute.xlu1 %704 }
 0x107   :  { %1040 = vmatmul.mubr.bf16.vlgmr.msra.gmra.mrb[16].mxu1 %v2280_v15 }
 0x108   :  { %1047 = vmatprep.mubr.bf16.mxu1 %v2283_v46 }
 0x109   :  { %v2969_v7 = vpop.permute.xlu0 %789  ;;  %v2971_v50 = vpop.permute.xlu1 %794 }
 0x10d   :  { %v710_v53 = vpop.permute.xlu0 %709  ;;  %v715_v57 = vpop.permute.xlu1 %714 }
 0x10f   :  { %1048 = vmatmul.mubr.bf16.gmra.mrb[20].mxu1 %v2285_v21 }
 0x110   :  { %1055 = vmatprep.mubr.bf16.mxu1 %v2286_v62 }
 0x111   :  { %v2973_v4 = vpop.permute.xlu0 %799  ;;  %v2978_v5 = vpop.permute.xlu1 %804 }
 0x115   :  { %v720_v19 = vpop.permute.xlu0 %719  ;;  %v725_v46 = vpop.permute.xlu1 %724 }
 0x117   :  { %1056 = vmatmul.mubr.bf16.gmra.mrb[24].mxu1 %v2288_v22 }
 0x118   :  { %1063 = vmatprep.mubr.bf16.mxu1 %v2289_v23 }
 0x11f   :  { %1064 = vmatmul.mubr.bf16.gmra.mrb[28].mxu1 %v2291_v24  ;;  %v2982_v24 = vpop.permute.xlu0 %809 }
 0x120   :  { %1071 = vmatprep.mubr.bf16.mxu1 %v2292_v25 }
 0x127   :  { %1072 = vmatmul.mubr.bf16.gmra.mrb[32].mxu1 %v2294_v56 }
 0x128   :  { %1079 = vmatprep.mubr.bf16.mxu1 %v2295_v52 }
 0x12f   :  { %1080 = vmatmul.mubr.bf16.gmra.mrb[36].mxu1 %v2297_v26 }
 0x130   :  { %1087 = vmatprep.mubr.bf16.mxu1 %v2298_v27  ;;  %v2986_v27 = vpop.permute.xlu1 %814 }
 0x137   :  { %1088 = vmatmul.mubr.bf16.gmra.mrb[40].mxu1 %v2300_v28 }
 0x138   :  { %1095 = vmatprep.mubr.bf16.mxu1 %v2301_v29 }
 0x13f   :  { %1096 = vmatmul.mubr.bf16.gmra.mrb[44].mxu1 %v2303_v30 }
 0x140   :  { %1103 = vmatprep.mubr.bf16.mxu1 %v2304_v33 }
 0x147   :  { %1104 = vmatmul.mubr.bf16.gmra.mrb[48].mxu1 %v2306_v34  ;;  %v730_v34 = vpop.permute.xlu0 %729 }
 0x148   :  { %1111 = vmatprep.mubr.bf16.mxu1 %v2307_v37 }
 0x14f   :  { %1112 = vmatmul.mubr.bf16.gmra.mrb[52].mxu1 %v2309_v38 }
 0x150   :  { %1119 = vmatprep.mubr.bf16.mxu1 %v2310_v39 }
 0x157   :  { %1120 = vmatmul.mubr.bf16.gmra.mrb[56].mxu1 %v2312_v12  ;;  %v735_v12 = vpop.permute.xlu1 %734 }
 0x158   :  { %1127 = vmatprep.mubr.bf16.mxu1 %v2313_v10 }
 0x15f   :  { %1128 = vmatmul.mubr.bf16.gmra.mrb[60].mxu1 %v2315_v40 }
 0x160   :  { %1135 = vmatprep.mubr.bf16.mxu1 %v2316_v41 }
 0x167   :  { %1136 = vmatmul.mubr.bf16.gmra.mrb[64].mxu1 %v2318_v8 }
 0x168   :  { %1143 = vmatprep.mubr.bf16.mxu1 %v2319_v32 }
 0x16f   :  { %1144 = vmatmul.mubr.bf16.gmra.mrb[68].mxu1 %v2321_v6 }
 0x170   :  { %1151 = vmatprep.mubr.bf16.mxu1 %v2322_v43 }
 0x177   :  { %1152 = vmatmul.mubr.bf16.gmra.mrb[72].mxu1 %v2324_v31  ;;  %v2990_v31 = vpop.permute.xlu0 %819 }
 0x178   :  { %1159 = vmatprep.mubr.bf16.mxu1 %v2325_v44 }
 0x17f   :  { %1160 = vmatmul.mubr.bf16.gmra.mrb[76].mxu1 %v2327_v42  ;;  %v2992_v42 = vpop.permute.xlu1 %824 }
 0x1da   :  { %v1993_v54 = vpop.f32.mrb[16].mxu1 }
 0x1db   :  { %v1994_v58 = vpop.f32.mrb[17].mxu1 }
 0x1dc   :  { %v1995_v59 = vadd.f32 %v1994_v58, %v1993_v54  ;;  %v1996_v60 = vpop.f32.mrb[18].mxu1  ;;  %v740_v58 = vpop.permute.xlu0 %739 }
 0x1dd   :  { %v1997_v63 = vpop.f32.mrb[19].mxu1 }
 0x1de   :  { %v1042_v0 = vadd.f32 %v1995_v59, %v690_v47  ;;  %v1998_v3 = vadd.f32 %v1997_v63, %v1996_v60 }
 0x1e0   :  { %v1045_v1 = vadd.f32 %v1998_v3, %v695_v48  ;;  %v1168_v16 = vmax.f32 %v1042_v0, 0.0  ;;  %v745_v0 = vpop.permute.xlu1 %744 }
 0x1e2   :  { %v1169_v17 = vmax.f32 %v1045_v1, 0.0  ;;  %v1999_v45 = vpop.f32.mrb[20].mxu1 }
 0x1e3   :  { %v2000_v55 = vpop.f32.mrb[21].mxu1 }
 0x1e4   :  { %v2980_v14 = vpack.c.bf16 %v1169_v17, %v1168_v16  ;;  %v2001_v18 = vadd.f32 %v2000_v55, %v1999_v45  ;;  %v2002_v51 = vpop.f32.mrb[22].mxu1  ;;  %v2996_v17 = vpop.permute.xlu0 %829 }
 0x1e5   :  { %v2003_v20 = vpop.f32.mrb[23].mxu1 }
 0x1e6   :  { %v1050_v2 = vadd.f32 %v2001_v18, %v700_v9  ;;  %v2004_v15 = vadd.f32 %v2003_v20, %v2002_v51 }
 0x1e8   :  { %v1053_v21 = vadd.f32 %v2004_v15, %v705_v35  ;;  %v1170_v62 = vmax.f32 %v1050_v2, 0.0 }
 0x1ea   :  { %v1171_v22 = vmax.f32 %v1053_v21, 0.0  ;;  %v2005_v23 = vpop.f32.mrb[24].mxu1  ;;  %v750_v21 = vpop.permute.xlu0 %749 }
 0x1eb   :  { %v2006_v25 = vpop.f32.mrb[25].mxu1 }
 0x1ec   :  { %v2984_v56 = vpack.c.bf16 %v1171_v22, %v1170_v62  ;;  %v2007_v52 = vadd.f32 %v2006_v25, %v2005_v23  ;;  %v2008_v26 = vpop.f32.mrb[26].mxu1 }
 0x1ed   :  { %v2009_v28 = vpop.f32.mrb[27].mxu1 }
 0x1ee   :  { %v1058_v29 = vadd.f32 %v2007_v52, %v710_v53  ;;  %v2010_v30 = vadd.f32 %v2009_v28, %v2008_v26 }
 0x1f0   :  { %v1061_v33 = vadd.f32 %v2010_v30, %v715_v57  ;;  %v1172_v37 = vmax.f32 %v1058_v29, 0.0 }
 0x1f2   :  { %v1173_v38 = vmax.f32 %v1061_v33, 0.0  ;;  %v2011_v39 = vpop.f32.mrb[28].mxu1 }
 0x1f3   :  { %v2012_v10 = vpop.f32.mrb[29].mxu1 }
 0x1f4   :  { %v2988_v40 = vpack.c.bf16 %v1173_v38, %v1172_v37  ;;  %v2013_v41 = vadd.f32 %v2012_v10, %v2011_v39  ;;  %v2014_v8 = vpop.f32.mrb[30].mxu1  ;;  %v3004_v37 = vpop.permute.xlu0 %839 }
 0x1f5   :  { %v2015_v32 = vpop.f32.mrb[31].mxu1 }
 0x1f6   :  { %v1066_v6 = vadd.f32 %v2013_v41, %v720_v19  ;;  %v2016_v43 = vadd.f32 %v2015_v32, %v2014_v8  ;;  %v3000_v19 = vpop.permute.xlu1 %834 }
 0x1f8   :  { %v1069_v44 = vadd.f32 %v2016_v43, %v725_v46  ;;  %v1174_v47 = vmax.f32 %v1066_v6, 0.0 }
 0x1fa   :  { %v1175_v48 = vmax.f32 %v1069_v44, 0.0  ;;  %v2017_v9 = vpop.f32.mrb[32].mxu1  ;;  %v755_v25 = vpop.permute.xlu1 %754 }
 0x1fb   :  { %v2018_v35 = vpop.f32.mrb[33].mxu1  ;;  %v760_v44 = vpop.permute.xlu0 %759 }
 0x1fc   :  { %v2994_v53 = vpack.c.bf16 %v1175_v48, %v1174_v47  ;;  %v2019_v54 = vadd.f32 %v2018_v35, %v2017_v9  ;;  %v2020_v57 = vpop.f32.mrb[34].mxu1 }
 0x1fd   :  { %v2021_v59 = vpop.f32.mrb[35].mxu1 }
 0x1fe   :  { %v1074_v60 = vadd.f32 %v2019_v54, %v730_v34  ;;  %v2022_v63 = vadd.f32 %v2021_v59, %v2020_v57  ;;  %v3006_v39 = vpop.permute.xlu1 %844 }
 0x200   :  { %v1077_v3 = vadd.f32 %v2022_v63, %v735_v12  ;;  %v1176_v61 = vmax.f32 %v1074_v60, 0.0 }
 0x202   :  { %v1177_v1 = vmax.f32 %v1077_v3, 0.0  ;;  %v2023_v16 = vpop.f32.mrb[36].mxu1  ;;  %v765_v35 = vpop.permute.xlu1 %764 }
 0x203   :  { %v2024_v45 = vpop.f32.mrb[37].mxu1 }
 0x204   :  { %v2998_v55 = vpack.c.bf16 %v1177_v1, %v1176_v61  ;;  %v2025_v18 = vadd.f32 %v2024_v45, %v2023_v16  ;;  %v2026_v51 = vpop.f32.mrb[38].mxu1 }
 0x205   :  { %v2027_v20 = vpop.f32.mrb[39].mxu1 }
 0x206   :  { %v1082_v2 = vadd.f32 %v2025_v18, %v740_v58  ;;  %v2028_v15 = vadd.f32 %v2027_v20, %v2026_v51 }
 0x208   :  { %v1085_v46 = vadd.f32 %v2028_v15, %v745_v0  ;;  %v1178_v62 = vmax.f32 %v1082_v2, 0.0 }
 0x20a   :  { %v1179_v22 = vmax.f32 %v1085_v46, 0.0  ;;  %v2029_v23 = vpop.f32.mrb[40].mxu1 }
 0x20b   :  { %v2030_v52 = vpop.f32.mrb[41].mxu1 }
 0x20c   :  { %v3002_v26 = vpack.c.bf16 %v1179_v22, %v1178_v62  ;;  %v2031_v28 = vadd.f32 %v2030_v52, %v2029_v23  ;;  %v2032_v29 = vpop.f32.mrb[42].mxu1 }
 0x20d   :  { %v2033_v30 = vpop.f32.mrb[43].mxu1 }
 0x20e   :  { %v1090_v33 = vadd.f32 %v2031_v28, %v750_v21  ;;  %v2034_v34 = vadd.f32 %v2033_v30, %v2032_v29 }
 0x210   :  { %v1093_v38 = vadd.f32 %v2034_v34, %v755_v25  ;;  %v1180_v12 = vmax.f32 %v1090_v33, 0.0 }
 0x212   :  { %v1181_v10 = vmax.f32 %v1093_v38, 0.0  ;;  %v2035_v41 = vpop.f32.mrb[44].mxu1 }
 0x213   :  { %v2036_v8 = vpop.f32.mrb[45].mxu1 }
 0x214   :  { %v3008_v32 = vpack.c.bf16 %v1181_v10, %v1180_v12  ;;  %v2037_v6 = vadd.f32 %v2036_v8, %v2035_v41  ;;  %v2038_v43 = vpop.f32.mrb[46].mxu1 }
 0x215   :  { %v2039_v47 = vpop.f32.mrb[47].mxu1 }
 0x216   :  { %v1098_v48 = vadd.f32 %v2037_v6, %v760_v44  ;;  %v2040_v9 = vadd.f32 %v2039_v47, %v2038_v43 }
 0x218   :  { %v1101_v54 = vadd.f32 %v2040_v9, %v765_v35  ;;  %v1182_v57 = vmax.f32 %v1098_v48, 0.0 }
 0x21a   :  { %v1183_v58 = vmax.f32 %v1101_v54, 0.0  ;;  %v2041_v59 = vpop.f32.mrb[48].mxu1 }
 0x21b   :  { %v2042_v60 = vpop.f32.mrb[49].mxu1 }
 0x21c   :  { %v3010_v63 = vpack.c.bf16 %v1183_v58, %v1182_v57  ;;  %v2043_v0 = vadd.f32 %v2042_v60, %v2041_v59  ;;  %v2044_v3 = vpop.f32.mrb[50].mxu1 }
 0x21d   :  { %v2045_v61 = vpop.f32.mrb[51].mxu1 }
 0x21e   :  { %v1106_v1 = vadd.f32 %v2043_v0, %v2961_v13  ;;  %v2046_v16 = vadd.f32 %v2045_v61, %v2044_v3 }
 0x220   :  { %v1109_v45 = vadd.f32 %v2046_v16, %v2963_v11  ;;  %v1184_v18 = vmax.f32 %v1106_v1, 0.0 }
 0x222   :  { %v1185_v51 = vmax.f32 %v1109_v45, 0.0  ;;  %v2047_v20 = vpop.f32.mrb[52].mxu1 }
 0x223   :  { %v2048_v2 = vpop.f32.mrb[53].mxu1 }
 0x224   :  { %v2049_v15 = vadd.f32 %v2048_v2, %v2047_v20  ;;  %v2050_v46 = vpop.f32.mrb[54].mxu1  ;;  %v1240_v21 = vpack.c.bf16 %v1185_v51, %v1184_v18 }
 0x225   :  { %v2051_v62 = vpop.f32.mrb[55].mxu1 }
 0x226   :  { %v1114_v22 = vadd.f32 %v2049_v15, %v2965_v36  ;;  %v2052_v23 = vadd.f32 %v2051_v62, %v2050_v46  ;;  %2089 = vmatprep.subr.bf16.mxu0 %v1240_v21 }
 0x227   :  { %2090 = vmatpush3.bf16.msra.mxu0 %v2980_v14 }
 0x228   :  { %v1117_v25 = vadd.f32 %v2052_v23, %v2967_v49  ;;  %v1186_v13 = vmax.f32 %v1114_v22, 0.0 }
 0x22a   :  { %v1187_v52 = vmax.f32 %v1117_v25, 0.0  ;;  %v2053_v28 = vpop.f32.mrb[56].mxu1 }
 0x22b   :  { %v2054_v11 = vpop.f32.mrb[57].mxu1 }
 0x22c   :  { %v2055_v29 = vadd.f32 %v2054_v11, %v2053_v28  ;;  %v2056_v30 = vpop.f32.mrb[58].mxu1  ;;  %v1241_v33 = vpack.c.bf16 %v1187_v52, %v1186_v13 }
 0x22d   :  { %v2057_v34 = vpop.f32.mrb[59].mxu1 }
 0x22e   :  { %v1122_v38 = vadd.f32 %v2055_v29, %v2969_v7  ;;  %v2058_v12 = vadd.f32 %v2057_v34, %v2056_v30  ;;  %2091 = vmatprep.subr.bf16.mxu0 %v1241_v33 }
 0x22f   :  { %2092 = vmatpush3.bf16.msra.mxu0 %v2984_v56 }
 0x230   :  { %v1125_v36 = vadd.f32 %v2058_v12, %v2971_v50  ;;  %v1188_v10 = vmax.f32 %v1122_v38, 0.0 }
 0x232   :  { %v1189_v14 = vmax.f32 %v1125_v36, 0.0  ;;  %v2059_v41 = vpop.f32.mrb[60].mxu1  ;;  %v2337_v36 = vld [vmem:[%s3231_s3 + $0x34] ss:$8 sps:$4 sm:$0xff]  }
 0x233   :  { %v2060_v49 = vpop.f32.mrb[61].mxu1 }
 0x234   :  { %v2061_v8 = vadd.f32 %v2060_v49, %v2059_v41  ;;  %v2062_v6 = vpop.f32.mrb[62].mxu1  ;;  %v1242_v43 = vpack.c.bf16 %v1189_v14, %v1188_v10  ;;  %v2339_v10 = vld [vmem:[%s3231_s3 + $0x30] ss:$8 sps:$4 sm:$0xff]   ;;  %v2340_v14 = vld [vmem:[%s3231_s3 + $0x44] ss:$8 sps:$4 sm:$0xff]  }
 0x235   :  { %v2063_v44 = vpop.f32.mrb[63].mxu1  ;;  %v2342_v41 = vld [vmem:[%s3231_s3 + $0x40] ss:$8 sps:$4 sm:$0xff]   ;;  %v2343_v49 = vld [vmem:[%s3231_s3 + $0x54] ss:$8 sps:$4 sm:$0xff]  }
 0x236   :  { %v1130_v47 = vadd.f32 %v2061_v8, %v2973_v4  ;;  %v2064_v48 = vadd.f32 %v2063_v44, %v2062_v6  ;;  %2093 = vmatprep.subr.bf16.mxu0 %v1242_v43  ;;  %v2345_v8 = vld [vmem:[%s3231_s3 + $0x50] ss:$8 sps:$4 sm:$0xff]   ;;  %v2346_v6 = vld [vmem:[%s3231_s3 + $0x64] ss:$8 sps:$4 sm:$0xff]   ;;  %v2348_v43 = vld [vmem:[%s3231_s3 + $0x60] ss:$8 sps:$4 sm:$0xff]  }
 0x237   :  { %2094 = vmatpush3.bf16.msra.mxu0 %v2988_v40  ;;  %v2349_v44 = vld [vmem:[%s3231_s3 + $0x74] ss:$8 sps:$4 sm:$0xff]  }
 0x238   :  { %v1133_v7 = vadd.f32 %v2064_v48, %v2978_v5  ;;  %v1190_v9 = vmax.f32 %v1130_v47, 0.0  ;;  %v2351_v47 = vld [vmem:[%s3231_s3 + $0x70] ss:$8 sps:$4 sm:$0xff]   ;;  %v2352_v48 = vld [vmem:[%s3231_s3 + $0x84] ss:$8 sps:$4 sm:$0xff]  }
 0x23a   :  { %v1191_v56 = vmax.f32 %v1133_v7, 0.0  ;;  %v2065_v35 = vpop.f32.mrb[64].mxu1  ;;  %v2354_v7 = vld [vmem:[%s3231_s3 + $0x80] ss:$8 sps:$4 sm:$0xff]  }
 0x23b   :  { %v2066_v50 = vpop.f32.mrb[65].mxu1 }
 0x23c   :  { %v2067_v54 = vadd.f32 %v2066_v50, %v2065_v35  ;;  %v2068_v57 = vpop.f32.mrb[66].mxu1  ;;  %v1243_v58 = vpack.c.bf16 %v1191_v56, %v1190_v9  ;;  %v2355_v9 = vld [vmem:[%s3231_s3 + $0x94] ss:$8 sps:$4 sm:$0xff]   ;;  %v2357_v56 = vld [vmem:[%s3231_s3 + $0x90] ss:$8 sps:$4 sm:$0xff]  }
 0x23d   :  { %v2069_v59 = vpop.f32.mrb[67].mxu1  ;;  %v2358_v35 = vld [vmem:[%s3231_s3 + $0xa4] ss:$8 sps:$4 sm:$0xff]   ;;  %v2360_v50 = vld [vmem:[%s3231_s3 + $0xa0] ss:$8 sps:$4 sm:$0xff]  }
 0x23e   :  { %v1138_v60 = vadd.f32 %v2067_v54, %v2982_v24  ;;  %v2070_v0 = vadd.f32 %v2069_v59, %v2068_v57  ;;  %2095 = vmatprep.subr.bf16.mxu0 %v1243_v58  ;;  %v2361_v54 = vld [vmem:[%s3231_s3 + $0xb4] ss:$8 sps:$4 sm:$0xff]   ;;  %v2363_v57 = vld [vmem:[%s3231_s3 + $0xb0] ss:$8 sps:$4 sm:$0xff]   ;;  %v2364_v58 = vld [vmem:[%s3231_s3 + $0xc4] ss:$8 sps:$4 sm:$0xff]  }
 0x23f   :  { %2096 = vmatpush3.bf16.msra.mxu0 %v2994_v53  ;;  %v2366_v59 = vld [vmem:[%s3231_s3 + $0xc0] ss:$8 sps:$4 sm:$0xff]  }
 0x240   :  { %v1141_v4 = vadd.f32 %v2070_v0, %v2986_v27  ;;  %v1192_v3 = vmax.f32 %v1138_v60, 0.0  ;;  %v2367_v60 = vld [vmem:[%s3231_s3 + $0xd4] ss:$8 sps:$4 sm:$0xff]   ;;  %v2369_v0 = vld [vmem:[%s3231_s3 + $0xd0] ss:$8 sps:$4 sm:$0xff]  }
 0x242   :  { %v1193_v40 = vmax.f32 %v1141_v4, 0.0  ;;  %v2071_v61 = vpop.f32.mrb[68].mxu1  ;;  %v2370_v4 = vld [vmem:[%s3231_s3 + $0xe4] ss:$8 sps:$4 sm:$0xff]  }
 0x243   :  { %v2072_v5 = vpop.f32.mrb[69].mxu1 }
 0x244   :  { %v2073_v1 = vadd.f32 %v2072_v5, %v2071_v61  ;;  %v2074_v16 = vpop.f32.mrb[70].mxu1  ;;  %v1244_v45 = vpack.c.bf16 %v1193_v40, %v1192_v3  ;;  %v2372_v3 = vld [vmem:[%s3231_s3 + $0xe0] ss:$8 sps:$4 sm:$0xff]   ;;  %v2373_v40 = vld [vmem:[%s3231_s3 + $0xf4] ss:$8 sps:$4 sm:$0xff]   ;;  %v3129_v5 = vpop.permute.xlu0 %1330 }
 0x245   :  { %v2075_v18 = vpop.f32.mrb[71].mxu1  ;;  %v2375_v61 = vld [vmem:[%s3231_s3 + $0xf0] ss:$8 sps:$4 sm:$0xff]  }
 0x246   :  { %v1146_v51 = vadd.f32 %v2073_v1, %v2990_v31  ;;  %v2076_v20 = vadd.f32 %v2075_v18, %v2074_v16  ;;  %2097 = vmatprep.subr.bf16.mxu0 %v1244_v45  ;;  %v3131_v1 = vpop.permute.xlu1 %1335 }
 0x247   :  { %2098 = vmatpush3.bf16.msra.mxu0 %v2998_v55 }
 0x248   :  { %v1149_v24 = vadd.f32 %v2076_v20, %v2992_v42  ;;  %v1194_v2 = vmax.f32 %v1146_v51, 0.0  ;;  %v1251_v16 = vpop.permute.xlu0 %1250 }
 0x24a   :  { %v1195_v53 = vmax.f32 %v1149_v24, 0.0  ;;  %v2077_v15 = vpop.f32.mrb[72].mxu1  ;;  %v1256_v45 = vpop.permute.xlu1 %1255 }
 0x24b   :  { %v2078_v27 = vpop.f32.mrb[73].mxu1 }
 0x24c   :  { %v2079_v46 = vadd.f32 %v2078_v27, %v2077_v15  ;;  %v2080_v21 = vpop.f32.mrb[74].mxu1  ;;  %v1245_v62 = vpack.c.bf16 %v1195_v53, %v1194_v2  ;;  %v3133_v18 = vpop.permute.xlu0 %1340 }
 0x24d   :  { %v2081_v22 = vpop.f32.mrb[75].mxu1 }
 0x24e   :  { %v1154_v23 = vadd.f32 %v2079_v46, %v2996_v17  ;;  %v2082_v25 = vadd.f32 %v2081_v22, %v2080_v21  ;;  %2099 = vmatprep.subr.bf16.mxu0 %v1245_v62  ;;  %v3135_v51 = vpop.permute.xlu1 %1345  ;;  %v2401_v46 = vmov 1966171168   ;;  %v1795_v62 = vlaneseq }
 0x24f   :  { %2100 = vmatpush3.bf16.msra.mxu0 %v3002_v26  ;;  %v1793_v21 = vunpack.c.l.s4 %v2401_v46 }
 0x250   :  { %v1157_v31 = vadd.f32 %v2082_v25, %v3000_v19  ;;  %v1196_v13 = vmax.f32 %v1154_v23, 0.0  ;;  %v2328_v19 = vld [vmem:[%s3231_s3] ss:$8 sps:$4 sm:$0xff]   ;;  %v1261_v20 = vpop.permute.xlu0 %1260 }
 0x252   :  { %v1197_v55 = vmax.f32 %v1157_v31, 0.0  ;;  %v2083_v52 = vpop.f32.mrb[76].mxu1  ;;  %v1266_v24 = vpop.permute.xlu1 %1265 }
 0x253   :  { %v2084_v42 = vpop.f32.mrb[77].mxu1 }
 0x254   :  { %v2085_v28 = vadd.f32 %v2084_v42, %v2083_v52  ;;  %v2086_v11 = vpop.f32.mrb[78].mxu1  ;;  %v1246_v29 = vpack.c.bf16 %v1197_v55, %v1196_v13  ;;  %v3137_v2 = vpop.permute.xlu0 %1350  ;;  %v1794_v13 = vunpack.c.0.s8 %v1793_v21  ;;  %v1796_v55 = vshrl.u32 %v1795_v62, 7  ;;  %v3144_v42 = vld.sshfl [vmem:[%s3232_s4] sm:$0x11 pattern:$0x75316420] }
 0x255   :  { %v2087_v30 = vpop.f32.mrb[79].mxu1  ;;  %s2402_s4 = smov [#allocation2]  }
 0x256   :  { %v1162_v33 = vadd.f32 %v2085_v28, %v3004_v37  ;;  %v2088_v34 = vadd.f32 %v2087_v30, %v2086_v11  ;;  %2101 = vmatprep.subr.bf16.mxu0 %v1246_v29  ;;  %v2331_v37 = vld [vmem:[%s3231_s3 + $0x14] ss:$8 sps:$4 sm:$0xff]   ;;  %v3139_v53 = vpop.permute.xlu1 %1355  ;;  %v1791_v29 = vcombine.high %v3144_v42, %v3144_v42  ;;  %v3148_v30 = vsub.s32 %v1794_v13, %v1796_v55  ;;  %s1855_s12 = sshll.u32 %s2402_s4, 4  ;;  %s1856_s12 = int_to_ptr.vmem [resolvable:$true] %s1855_s12 }
 0x257   :  { %2102 = vmatpush3.bf16.msra.mxu0 %v3008_v32  ;;  %v2334_v32 = vld [vmem:[%s3231_s3 + $0x24] ss:$8 sps:$4 sm:$0xff]   ;;  %s2376_s0 = scalar_lea.vmem %s1856_s12, 16  ;;  %s2380_s13 = scalar_lea.vmem %s1856_s12, 32 }
 0x258   :  { %v1165_v17 = vadd.f32 %v2088_v34, %v3006_v39  ;;  %v1198_v38 = vmax.f32 %v1162_v33, 0.0  ;;  %v2333_v39 = vld [vmem:[%s3231_s3 + $0x10] ss:$8 sps:$4 sm:$0xff]   ;;  %v1271_v15 = vpop.permute.xlu0 %1270  ;;  %p2377_p0 = scmp.ne.s32.totalorder %s1856_s12, %s2376_s0  ;;  %p2381_p1 = scmp.lt.s32.totalorder %s1856_s12, %s1856_s12 }
 0x259   :  { %p2382_p2 = scmp.lt.s32.totalorder %s2380_s13, %s2376_s0 }
 0x25a   :  { %v1199_v26 = vmax.f32 %v1165_v17, 0.0  ;;  %v1276_v22 = vpop.permute.xlu1 %1275  ;;  %v1798_v17 = vrot.slane %v3144_v42, %v3148_v30 }
 0x25b   :  { %p2383_p3 = por %p2382_p2, %p2381_p1 }
 0x25c   :  { %v1247_v12 = vpack.c.bf16 %v1199_v26, %v1198_v38  ;;  %v3150_v33 = vpop.permute.xlu0 %1360  ;;  %v1805_v38 = vrot.slane %v1791_v29, %v3148_v30 }
 0x25d   :  { %p2384_p4 = pnand %p2383_p3, %p2377_p0 }
 0x25e   :  { %2103 = vmatprep.subr.bf16.mxu0 %v1247_v12  ;;  %v3155_v26 = vpop.permute.xlu1 %1365  ;;  %1840 = vmatprep.mubr.bf16.mxu1 %v1805_v38 }
 0x25f   :  { %2104 = vmatpush3.bf16.msra.mxu0 %v3010_v63  ;;  %v2336_v63 = vld [vmem:[%s3231_s3 + $0x20] ss:$8 sps:$4 sm:$0xff]  }
 0x262   :  { %1601 = vmatmul.mubr.bf16.vlgmr.msra.gmra.mrb[16].mxu0 %v2328_v19 }
 0x263   :  { %1608 = vmatprep.mubr.bf16.mxu0 %v2331_v37 }
 0x26a   :  { %1609 = vmatmul.mubr.bf16.gmra.mrb[20].mxu0 %v2333_v39 }
 0x26b   :  { %1616 = vmatprep.mubr.bf16.mxu0 %v2334_v32 }
 0x272   :  { %1617 = vmatmul.mubr.bf16.gmra.mrb[24].mxu0 %v2336_v63 }
 0x273   :  { %1624 = vmatprep.mubr.bf16.mxu0 %v2337_v36 }
 0x27a   :  { %1625 = vmatmul.mubr.bf16.gmra.mrb[28].mxu0 %v2339_v10  ;;  %v1281_v10 = vpop.permute.xlu0 %1280 }
 0x27b   :  { %1632 = vmatprep.mubr.bf16.mxu0 %v2340_v14 }
 0x282   :  { %1633 = vmatmul.mubr.bf16.gmra.mrb[32].mxu0 %v2342_v41 }
 0x283   :  { %1640 = vmatprep.mubr.bf16.mxu0 %v2343_v49 }
 0x28a   :  { %1641 = vmatmul.mubr.bf16.gmra.mrb[36].mxu0 %v2345_v8  ;;  %v1286_v8 = vpop.permute.xlu1 %1285 }
 0x28b   :  { %1648 = vmatprep.mubr.bf16.mxu0 %v2346_v6 }
 0x292   :  { %1649 = vmatmul.mubr.bf16.gmra.mrb[40].mxu0 %v2348_v43 }
 0x293   :  { %1656 = vmatprep.mubr.bf16.mxu0 %v2349_v44 }
 0x29a   :  { %1657 = vmatmul.mubr.bf16.gmra.mrb[44].mxu0 %v2351_v47 }
 0x29b   :  { %1664 = vmatprep.mubr.bf16.mxu0 %v2352_v48  ;;  %v3159_v48 = vpop.permute.xlu0 %1370 }
 0x2a2   :  { %1665 = vmatmul.mubr.bf16.gmra.mrb[48].mxu0 %v2354_v7 }
 0x2a3   :  { %1672 = vmatprep.mubr.bf16.mxu0 %v2355_v9 }
 0x2aa   :  { %1673 = vmatmul.mubr.bf16.gmra.mrb[52].mxu0 %v2357_v56 }
 0x2ab   :  { %1680 = vmatprep.mubr.bf16.mxu0 %v2358_v35 }
 0x2b2   :  { %1681 = vmatmul.mubr.bf16.gmra.mrb[56].mxu0 %v2360_v50  ;;  %v3163_v50 = vpop.permute.xlu1 %1375 }
 0x2b3   :  { %1688 = vmatprep.mubr.bf16.mxu0 %v2361_v54 }
 0x2ba   :  { %1689 = vmatmul.mubr.bf16.gmra.mrb[60].mxu0 %v2363_v57 }
 0x2bb   :  { %1696 = vmatprep.mubr.bf16.mxu0 %v2364_v58 }
 0x2c2   :  { %1697 = vmatmul.mubr.bf16.gmra.mrb[64].mxu0 %v2366_v59 }
 0x2c3   :  { %1704 = vmatprep.mubr.bf16.mxu0 %v2367_v60  ;;  %v1291_v60 = vpop.permute.xlu0 %1290 }
 0x2c7   :  { %v3167_v21 = vpop.permute.xlu0 %1380 }
 0x2ca   :  { %1705 = vmatmul.mubr.bf16.gmra.mrb[68].mxu0 %v2369_v0 }
 0x2cb   :  { %1712 = vmatprep.mubr.bf16.mxu0 %v2370_v4 }
 0x2d2   :  { %1713 = vmatmul.mubr.bf16.gmra.mrb[72].mxu0 %v2372_v3 }
 0x2d3   :  { %1720 = vmatprep.mubr.bf16.mxu0 %v2373_v40  ;;  %v1296_v40 = vpop.permute.xlu1 %1295 }
 0x2da   :  { %1721 = vmatmul.mubr.bf16.gmra.mrb[76].mxu0 %v2375_v61 }
 0x335   :  { %v2105_v27 = vpop.f32.mrb[16].mxu0 }
 0x336   :  { %v2106_v23 = vpop.f32.mrb[17].mxu0 }
 0x337   :  { %v2107_v25 = vadd.f32 %v2106_v23, %v2105_v27  ;;  %v2108_v31 = vpop.f32.mrb[18].mxu0  ;;  %v3169_v23 = vpop.permute.xlu1 %1385 }
 0x338   :  { %v2109_v52 = vpop.f32.mrb[19].mxu0 }
 0x339   :  { %v1603_v28 = vadd.f32 %v2107_v25, %v1251_v16  ;;  %v2110_v11 = vadd.f32 %v2109_v52, %v2108_v31 }
 0x33b   :  { %v1606_v34 = vadd.f32 %v2110_v11, %v1256_v45  ;;  %v1729_v12 = vmax.f32 %v1603_v28, 0.0  ;;  %v1301_v28 = vpop.permute.xlu0 %1300  ;;  %v1306_v38 = vpop.permute.xlu1 %1305 }
 0x33d   :  { %v1730_v19 = vmax.f32 %v1606_v34, 0.0  ;;  %v2111_v37 = vpop.f32.mrb[20].mxu0 }
 0x33e   :  { %v2112_v39 = vpop.f32.mrb[21].mxu0 }
 0x33f   :  { %v3157_v32 = vpack.c.bf16 %v1730_v19, %v1729_v12  ;;  %v2113_v63 = vadd.f32 %v2112_v39, %v2111_v37  ;;  %v2114_v36 = vpop.f32.mrb[22].mxu0 }
 0x340   :  { %v2115_v14 = vpop.f32.mrb[23].mxu0 }
 0x341   :  { %v1611_v41 = vadd.f32 %v2113_v63, %v1261_v20  ;;  %v2116_v49 = vadd.f32 %v2115_v14, %v2114_v36  ;;  %v3173_v63 = vpop.permute.xlu0 %1390 }
 0x343   :  { %v1614_v6 = vadd.f32 %v2116_v49, %v1266_v24  ;;  %v1731_v43 = vmax.f32 %v1611_v41, 0.0  ;;  %v3177_v49 = vpop.permute.xlu1 %1395 }
 0x345   :  { %v1732_v44 = vmax.f32 %v1614_v6, 0.0  ;;  %v2117_v47 = vpop.f32.mrb[24].mxu0 }
 0x346   :  { %v2118_v7 = vpop.f32.mrb[25].mxu0 }
 0x347   :  { %v3161_v9 = vpack.c.bf16 %v1732_v44, %v1731_v43  ;;  %v2119_v56 = vadd.f32 %v2118_v7, %v2117_v47  ;;  %v2120_v35 = vpop.f32.mrb[26].mxu0  ;;  %v1311_v47 = vpop.permute.xlu0 %1310 }
 0x348   :  { %v2121_v54 = vpop.f32.mrb[27].mxu0 }
 0x349   :  { %v1619_v57 = vadd.f32 %v2119_v56, %v1271_v15  ;;  %v2122_v58 = vadd.f32 %v2121_v54, %v2120_v35  ;;  %v1316_v54 = vpop.permute.xlu1 %1315 }
 0x34b   :  { %v1622_v59 = vadd.f32 %v2122_v58, %v1276_v22  ;;  %v1733_v0 = vmax.f32 %v1619_v57, 0.0 }
 0x34d   :  { %v1734_v4 = vmax.f32 %v1622_v59, 0.0  ;;  %v2123_v3 = vpop.f32.mrb[28].mxu0 }
 0x34e   :  { %v2124_v61 = vpop.f32.mrb[29].mxu0 }
 0x34f   :  { %v3165_v16 = vpack.c.bf16 %v1734_v4, %v1733_v0  ;;  %v2125_v45 = vadd.f32 %v2124_v61, %v2123_v3  ;;  %v2126_v20 = vpop.f32.mrb[30].mxu0 }
 0x350   :  { %v2127_v24 = vpop.f32.mrb[31].mxu0 }
 0x351   :  { %v1627_v27 = vadd.f32 %v2125_v45, %v1281_v10  ;;  %v2128_v46 = vadd.f32 %v2127_v24, %v2126_v20  ;;  %v3183_v45 = vpop.permute.xlu1 %1405 }
 0x353   :  { %v1630_v62 = vadd.f32 %v2128_v46, %v1286_v8  ;;  %v1735_v15 = vmax.f32 %v1627_v27, 0.0 }
 0x355   :  { %v1736_v22 = vmax.f32 %v1630_v62, 0.0  ;;  %v2129_v25 = vpop.f32.mrb[32].mxu0 }
 0x356   :  { %v2130_v31 = vpop.f32.mrb[33].mxu0 }
 0x357   :  { %v3171_v13 = vpack.c.bf16 %v1736_v22, %v1735_v15  ;;  %v2131_v55 = vadd.f32 %v2130_v31, %v2129_v25  ;;  %v2132_v52 = vpop.f32.mrb[34].mxu0 }
 0x358   :  { %v2133_v11 = vpop.f32.mrb[35].mxu0 }
 0x359   :  { %v1635_v29 = vadd.f32 %v2131_v55, %v1291_v60  ;;  %v2134_v34 = vadd.f32 %v2133_v11, %v2132_v52 }
 0x35b   :  { %v1638_v12 = vadd.f32 %v2134_v34, %v1296_v40  ;;  %v1737_v19 = vmax.f32 %v1635_v29, 0.0  ;;  %v3181_v40 = vpop.permute.xlu0 %1400 }
 0x35d   :  { %v1738_v37 = vmax.f32 %v1638_v12, 0.0  ;;  %v2135_v39 = vpop.f32.mrb[36].mxu0 }
 0x35e   :  { %v2136_v36 = vpop.f32.mrb[37].mxu0 }
 0x35f   :  { %v3175_v10 = vpack.c.bf16 %v1738_v37, %v1737_v19  ;;  %v2137_v14 = vadd.f32 %v2136_v36, %v2135_v39  ;;  %v2138_v41 = vpop.f32.mrb[38].mxu0  ;;  %v1321_v25 = vpop.permute.xlu0 %1320 }
 0x360   :  { %v2139_v8 = vpop.f32.mrb[39].mxu0 }
 0x361   :  { %v1643_v6 = vadd.f32 %v2137_v14, %v1301_v28  ;;  %v2140_v43 = vadd.f32 %v2139_v8, %v2138_v41  ;;  %v1326_v28 = vpop.permute.xlu1 %1325 }
 0x363   :  { %v1646_v44 = vadd.f32 %v2140_v43, %v1306_v38  ;;  %v1739_v7 = vmax.f32 %v1643_v6, 0.0 }
 0x365   :  { %v1740_v56 = vmax.f32 %v1646_v44, 0.0  ;;  %v2141_v35 = vpop.f32.mrb[40].mxu0 }
 0x366   :  { %v2142_v57 = vpop.f32.mrb[41].mxu0 }
 0x367   :  { %v3179_v58 = vpack.c.bf16 %v1740_v56, %v1739_v7  ;;  %v2143_v59 = vadd.f32 %v2142_v57, %v2141_v35  ;;  %v2144_v60 = vpop.f32.mrb[42].mxu0 }
 0x368   :  { %v2145_v0 = vpop.f32.mrb[43].mxu0 }
 0x369   :  { %v1651_v4 = vadd.f32 %v2143_v59, %v1311_v47  ;;  %v2146_v3 = vadd.f32 %v2145_v0, %v2144_v60 }
 0x36b   :  { %v1654_v61 = vadd.f32 %v2146_v3, %v1316_v54  ;;  %v1741_v20 = vmax.f32 %v1651_v4, 0.0 }
 0x36d   :  { %v1742_v24 = vmax.f32 %v1654_v61, 0.0  ;;  %v2147_v27 = vpop.f32.mrb[44].mxu0 }
 0x36e   :  { %v2148_v46 = vpop.f32.mrb[45].mxu0 }
 0x36f   :  { %v3185_v62 = vpack.c.bf16 %v1742_v24, %v1741_v20  ;;  %v2149_v15 = vadd.f32 %v2148_v46, %v2147_v27  ;;  %v2150_v22 = vpop.f32.mrb[46].mxu0 }
 0x370   :  { %v2151_v31 = vpop.f32.mrb[47].mxu0 }
 0x371   :  { %v1659_v55 = vadd.f32 %v2149_v15, %v1321_v25  ;;  %v2152_v52 = vadd.f32 %v2151_v31, %v2150_v22 }
 0x373   :  { %v1662_v11 = vadd.f32 %v2152_v52, %v1326_v28  ;;  %v1743_v29 = vmax.f32 %v1659_v55, 0.0 }
 0x375   :  { %v1744_v34 = vmax.f32 %v1662_v11, 0.0  ;;  %v2153_v38 = vpop.f32.mrb[48].mxu0 }
 0x376   :  { %v2154_v12 = vpop.f32.mrb[49].mxu0 }
 0x377   :  { %v3187_v19 = vpack.c.bf16 %v1744_v34, %v1743_v29  ;;  %v2155_v37 = vadd.f32 %v2154_v12, %v2153_v38  ;;  %v2156_v39 = vpop.f32.mrb[50].mxu0 }
 0x378   :  { %v2157_v36 = vpop.f32.mrb[51].mxu0 }
 0x379   :  { %v1667_v14 = vadd.f32 %v2155_v37, %v3129_v5  ;;  %v2158_v41 = vadd.f32 %v2157_v36, %v2156_v39 }
 0x37b   :  { %v1670_v8 = vadd.f32 %v2158_v41, %v3131_v1  ;;  %v1745_v6 = vmax.f32 %v1667_v14, 0.0 }
 0x37d   :  { %v1746_v43 = vmax.f32 %v1670_v8, 0.0  ;;  %v2159_v44 = vpop.f32.mrb[52].mxu0 }
 0x37e   :  { %v2160_v47 = vpop.f32.mrb[53].mxu0 }
 0x37f   :  { %v2161_v7 = vadd.f32 %v2160_v47, %v2159_v44  ;;  %v2162_v56 = vpop.f32.mrb[54].mxu0  ;;  %v1770_v35 = vpack.c.bf16 %v1746_v43, %v1745_v6 }
 0x380   :  { %v2163_v54 = vpop.f32.mrb[55].mxu0 }
 0x381   :  { %v1675_v57 = vadd.f32 %v2161_v7, %v3133_v18  ;;  %v2164_v59 = vadd.f32 %v2163_v54, %v2162_v56  ;;  %2201 = vmatprep.subr.bf16.mxu1 %v1770_v35 }
 0x382   :  { %2202 = vmatpush3.bf16.msra.mxu1 %v3157_v32 }
 0x383   :  { %v1678_v60 = vadd.f32 %v2164_v59, %v3135_v51  ;;  %v1747_v5 = vmax.f32 %v1675_v57, 0.0 }
 0x385   :  { %v1748_v0 = vmax.f32 %v1678_v60, 0.0  ;;  %v2165_v4 = vpop.f32.mrb[56].mxu0 }
 0x386   :  { %v2166_v1 = vpop.f32.mrb[57].mxu0 }
 0x387   :  { %v2167_v3 = vadd.f32 %v2166_v1, %v2165_v4  ;;  %v2168_v61 = vpop.f32.mrb[58].mxu0  ;;  %v1771_v20 = vpack.c.bf16 %v1748_v0, %v1747_v5 }
 0x388   :  { %v2169_v24 = vpop.f32.mrb[59].mxu0 }
 0x389   :  { %v1683_v27 = vadd.f32 %v2167_v3, %v3137_v2  ;;  %v2170_v46 = vadd.f32 %v2169_v24, %v2168_v61  ;;  %2203 = vmatprep.subr.bf16.mxu1 %v1771_v20 }
 0x38a   :  { %2204 = vmatpush3.bf16.msra.mxu1 %v3161_v9 }
 0x38b   :  { %v1686_v18 = vadd.f32 %v2170_v46, %v3139_v53  ;;  %v1749_v15 = vmax.f32 %v1683_v27, 0.0 }
 0x38d   :  { %v1750_v32 = vmax.f32 %v1686_v18, 0.0  ;;  %v2171_v22 = vpop.f32.mrb[60].mxu0 }
 0x38e   :  { %v2172_v51 = vpop.f32.mrb[61].mxu0 }
 0x38f   :  { %v2173_v25 = vadd.f32 %v2172_v51, %v2171_v22  ;;  %v2174_v31 = vpop.f32.mrb[62].mxu0  ;;  %v1772_v55 = vpack.c.bf16 %v1750_v32, %v1749_v15 }
 0x390   :  { %v2175_v52 = vpop.f32.mrb[63].mxu0 }
 0x391   :  { %v1691_v28 = vadd.f32 %v2173_v25, %v3150_v33  ;;  %v2176_v11 = vadd.f32 %v2175_v52, %v2174_v31  ;;  %2205 = vmatprep.subr.bf16.mxu1 %v1772_v55  ;;  %v1781_v25 = vpop.permute.xlu0 %1780 }
 0x392   :  { %2206 = vmatpush3.bf16.msra.mxu1 %v3165_v16 }
 0x393   :  { %v1694_v2 = vadd.f32 %v2176_v11, %v3155_v26  ;;  %v1751_v29 = vmax.f32 %v1691_v28, 0.0 }
 0x395   :  { %v1752_v9 = vmax.f32 %v1694_v2, 0.0  ;;  %v2177_v34 = vpop.f32.mrb[64].mxu0 }
 0x396   :  { %v2178_v53 = vpop.f32.mrb[65].mxu0 }
 0x397   :  { %v2179_v38 = vadd.f32 %v2178_v53, %v2177_v34  ;;  %v2180_v12 = vpop.f32.mrb[66].mxu0  ;;  %v1773_v37 = vpack.c.bf16 %v1752_v9, %v1751_v29 }
 0x398   :  { %v2181_v39 = vpop.f32.mrb[67].mxu0 }
 0x399   :  { %v1699_v36 = vadd.f32 %v2179_v38, %v3159_v48  ;;  %v2182_v14 = vadd.f32 %v2181_v39, %v2180_v12  ;;  %2207 = vmatprep.subr.bf16.mxu1 %v1773_v37 }
 0x39a   :  { %2208 = vmatpush3.bf16.msra.mxu1 %v3171_v13 }
 0x39b   :  { %v1702_v33 = vadd.f32 %v2182_v14, %v3163_v50  ;;  %v1753_v41 = vmax.f32 %v1699_v36, 0.0 }
 0x39d   :  { %v1754_v16 = vmax.f32 %v1702_v33, 0.0  ;;  %v2183_v8 = vpop.f32.mrb[68].mxu0 }
 0x39e   :  { %v2184_v26 = vpop.f32.mrb[69].mxu0 }
 0x39f   :  { %v2185_v6 = vadd.f32 %v2184_v26, %v2183_v8  ;;  %v2186_v43 = vpop.f32.mrb[70].mxu0  ;;  %v1774_v44 = vpack.c.bf16 %v1754_v16, %v1753_v41 }
 0x3a0   :  { %v2187_v47 = vpop.f32.mrb[71].mxu0 }
 0x3a1   :  { %v1707_v7 = vadd.f32 %v2185_v6, %v3167_v21  ;;  %v2188_v56 = vadd.f32 %v2187_v47, %v2186_v43  ;;  %2209 = vmatprep.subr.bf16.mxu1 %v1774_v44 }
 0x3a2   :  { %2210 = vmatpush3.bf16.msra.mxu1 %v3175_v10 }
 0x3a3   :  { %v1710_v48 = vadd.f32 %v2188_v56, %v3169_v23  ;;  %v1755_v35 = vmax.f32 %v1707_v7, 0.0 }
 0x3a5   :  { %v1756_v13 = vmax.f32 %v1710_v48, 0.0  ;;  %v2189_v54 = vpop.f32.mrb[72].mxu0 }
 0x3a6   :  { %v2190_v50 = vpop.f32.mrb[73].mxu0 }
 0x3a7   :  { %v2191_v57 = vadd.f32 %v2190_v50, %v2189_v54  ;;  %v2192_v59 = vpop.f32.mrb[74].mxu0  ;;  %v1775_v60 = vpack.c.bf16 %v1756_v13, %v1755_v35 }
 0x3a8   :  { %v2193_v5 = vpop.f32.mrb[75].mxu0 }
 0x3a9   :  { %v1715_v0 = vadd.f32 %v2191_v57, %v3173_v63  ;;  %v2194_v4 = vadd.f32 %v2193_v5, %v2192_v59  ;;  %2211 = vmatprep.subr.bf16.mxu1 %v1775_v60 }
 0x3aa   :  { %2212 = vmatpush3.bf16.msra.mxu1 %v3179_v58 }
 0x3ab   :  { %v1718_v21 = vadd.f32 %v2194_v4, %v3177_v49  ;;  %v1757_v1 = vmax.f32 %v1715_v0, 0.0 }
 0x3ad   :  { %v1758_v10 = vmax.f32 %v1718_v21, 0.0  ;;  %v2195_v3 = vpop.f32.mrb[76].mxu0 }
 0x3ae   :  { %v2196_v23 = vpop.f32.mrb[77].mxu0 }
 0x3af   :  { %v2197_v61 = vadd.f32 %v2196_v23, %v2195_v3  ;;  %v2198_v20 = vpop.f32.mrb[78].mxu0  ;;  %v1776_v24 = vpack.c.bf16 %v1758_v10, %v1757_v1 }
 0x3b0   :  { %v2199_v27 = vpop.f32.mrb[79].mxu0 }
 0x3b1   :  { %v1723_v46 = vadd.f32 %v2197_v61, %v3181_v40  ;;  %v2200_v18 = vadd.f32 %v2199_v27, %v2198_v20  ;;  %2213 = vmatprep.subr.bf16.mxu1 %v1776_v24 }
 0x3b2   :  { %2214 = vmatpush3.bf16.msra.mxu1 %v3185_v62 }
 0x3b3   :  { %v1726_v63 = vadd.f32 %v2200_v18, %v3183_v45  ;;  %v1759_v15 = vmax.f32 %v1723_v46, 0.0 }
 0x3b5   :  { %v1760_v58 = vmax.f32 %v1726_v63, 0.0 }
 0x3b7   :  { %v1777_v32 = vpack.c.bf16 %v1760_v58, %v1759_v15 }
 0x3b9   :  { %2215 = vmatprep.subr.bf16.mxu1 %v1777_v32 }
 0x3ba   :  { %2216 = vmatpush3.bf16.msra.mxu1 %v3187_v19 }
 0x3bd   :  { %1841 = vmatmul.mubr.bf16.vlgmr.msra.gmra.mrb[80].mxu1 %v1798_v17 }
 0x490   :  { %v2217_v49 = vpop.f32.mrb[80].mxu1 }
 0x491   :  { %v2218_v22 = vpop.f32.mrb[81].mxu1 }
 0x492   :  { %v2219_v40 = vadd.f32 %v2218_v22, %v2217_v49  ;;  %v2220_v51 = vpop.f32.mrb[82].mxu1 }
 0x493   :  { %v2221_v62 = vpop.f32.mrb[83].mxu1 }
 0x494   :  { %v1843_v31 = vadd.f32 %v2219_v40, %v1781_v25 }
 0x496   :  { %1848 = vst [vmem:[#allocation2] sm:$0x1] %v1843_v31 }
 0x497   :  { %2387 = shalt.err (!%p2384_p4)
}
 0x498   :  { %s2388_s16 = scalar_lea.hbm %s3234_s6, 16 }
 0x499   :  { %p2389_p5 = scmp.ne.s32.totalorder %s3234_s6, %s2388_s16  ;;  %p2392_p6 = scmp.lt.u32.totalorder %s2388_s16, %s3234_s6 }
 0x49b   :  { %p2394_p7 = pnand %p2392_p6, %p2389_p5 }
 0x49d   :  { %2397 = shalt.err (!%p2394_p7)
}
 0x49e   :  { %1858 = dma.vmem_to_hbm [thread:$0]  %s1856_s12, 16, %s3234_s6, [#allocation3]  }
 0x49f   :  { %2398 = dma.done.wait [#allocation3], 16  }
 0x4a0   :  { %2399 = vsyncadd [#allocation3], 4294967280 }
 0x4a1   :  { %1862 = vsyncpa [#allocation3], 1 }

</bundles_post_ra>
